<compile_context>
chip_gen: v5e
topology: v5e:2x2
jax: 0.10.0
libtpu: 0.0.40
codegen_flags: <defaults>
</compile_context>

<pallas_src>
import functools

import jax
import jax.numpy as jnp
from jax.experimental import pallas as pl
from jax.experimental.pallas import tpu as pltpu

# characters = string.digits -> 10 symbols, blank index = 10, C = 11
CTC_BLANK = 10
NUM_CLASSES = CTC_BLANK + 1

NEG_INF = -1e30          # large-negative stand-in for -inf (avoids inf-inf NaNs)
S_PAD = 128              # blank-extended label dim padded to one lane register
B_TILE_MAX = 32          # up to 4 independent (8,128) vreg chains per grid step


def _round_up(x, m):
    return ((x + m - 1) // m) * m


def _ctc_kernel(in_len_smem,          # SMEM (N_pad,) int32   (scalar prefetch)
                lp_ref,               # (T_pad, B, C) f32     log-probs
                il_ref,               # (B, 1) int32          input lengths
                tl_ref,               # (B, 1) int32          target lengths
                ext_ref,              # (B, S_PAD) int32      blank-extended labels
                skip_ref,             # (B, S_PAD) int32      1 where s-2 skip legal
                out_ref,              # (1, B, 128) f32       per-item loss (lane-dense)
                emis_ref,             # scratch (T_pad, B, S_PAD) f32
                *, t_chunk):
    g = pl.program_id(0)

    Tp = lp_ref.shape[0]
    B = lp_ref.shape[1]
    C = lp_ref.shape[2]
    S = ext_ref.shape[1]
    assert Tp % t_chunk == 0
    n_chunks = Tp // t_chunk

    ext = ext_ref[...]                        # (B, S)
    il = il_ref[...]                          # (B, 1) int32
    tl = tl_ref[...]                          # (B, 1) int32

    # ---- emission gather, chunked over time (bounds live vregs / no spill) ----
    # emis[t, b, s] = lp[t, b, ext[b, s]] via C=11 VPU selects; MXU stays out.
    ext_b = ext[None, :, :]                   # (1, B, S)

    @pl.loop(0, n_chunks)
    def _(ci):
        t0 = pl.multiple_of(ci * t_chunk, t_chunk)
        lp_c = lp_ref[pl.ds(t0, t_chunk)]     # (t_chunk, B, C)
        em = jnp.zeros((t_chunk, B, S), jnp.float32)
        for c in range(C):                    # 11 selects, one-time cost
            em = jnp.where(ext_b == c, lp_c[:, :, c:c + 1], em)
        emis_ref[pl.ds(t0, t_chunk)] = em

    # ---- loop-invariant masks / constants (hoisted out of the hot loop) ----
    lane = jax.lax.broadcasted_iota(jnp.int32, (B, S), 1)
    neg = jnp.full((B, S), NEG_INF, jnp.float32)
    mask1 = lane >= 1
    skip_mask = skip_ref[...] > 0

    # alpha_0: only s=0 (blank) and s=1 (first label, if any) are reachable
    e0 = emis_ref[0]
    init_mask = (lane == 0) | ((lane == 1) & (tl > 0))
    alpha0 = jnp.where(init_mask, e0, neg)

    # max valid input length over this tile (SMEM scalars), clamped to the
    # padded time extent so emis_ref is never read out of bounds.
    base = g * B
    t_max = in_len_smem[base]
    for i in range(1, B):
        t_max = jnp.maximum(t_max, in_len_smem[base + i])
    t_max = jnp.minimum(t_max, Tp)

    def step(t, alpha):
        a1 = jnp.where(mask1, pltpu.roll(alpha, 1, 1), neg)
        a2 = jnp.where(skip_mask, pltpu.roll(alpha, 2, 1), neg)
        # 3-term logsumexp with the max term's exp(0)=1 folded out:
        # the two non-max values are min(alpha,a1) and min(max(alpha,a1), a2).
        hi01 = jnp.maximum(alpha, a1)
        lo01 = jnp.minimum(alpha, a1)
        m = jnp.maximum(hi01, a2)
        o2 = jnp.minimum(hi01, a2)
        lse = m + jnp.log(1.0 + jnp.exp(lo01 - m) + jnp.exp(o2 - m))
        new_alpha = emis_ref[t] + lse          # one full-vreg load per chain
        # freeze items of this tile that are already past their input length
        return jnp.where(t < il, new_alpha, alpha)

    alpha = jax.lax.fori_loop(1, t_max, step, alpha0)

    # total log prob = logsumexp(alpha[s_len-1], alpha[s_len-2]) per item
    s_last = 2 * tl                            # (B, 1)  == s_len - 1
    sel = (lane == s_last) | (lane == (s_last - 1))
    final = jnp.where(sel, alpha, neg)
    m = jnp.max(final, axis=1, keepdims=True)                      # (B, 1)
    logp = m + jnp.log(jnp.sum(jnp.exp(final - m), axis=1, keepdims=True))
    loss = -logp                                                   # (B, 1)

    # zero_infinity=True
    loss = jnp.where(loss >= jnp.float32(-0.5 * NEG_INF), 0.0, loss)
    # reduction='mean': per-item division by target length (clamped to 1)
    loss = loss / jnp.maximum(tl, 1).astype(jnp.float32)

    # lane-dense, unmasked store; wrapper reads lane 0
    out_ref[0] = jnp.broadcast_to(loss, (B, 128))


def focal_ctc_loss(log_probs, targets, input_lengths, target_lengths,
                   gamma=2.0, blank=CTC_BLANK):
    """log_probs: (T, N, C) log-softmax values, targets: (N, L_max) int."""
    T, N, C = log_probs.shape
    L_max = targets.shape[1]
    assert 2 * L_max + 1 <= S_PAD

    # Length-bucket: sort by input length (descending) so every tile's time
    # loop bound is tight. Final reduction is a mean, so no unsort needed.
    il_i32 = input_lengths.astype(jnp.int32)
    order = jnp.argsort(-il_i32)
    log_probs = log_probs[:, order, :]
    targets = targets[order]
    il_i32 = il_i32[order]
    tl_i32 = target_lengths.astype(jnp.int32)[order]

    # Batch tile: as wide as possible (up to 32 -> 4 vreg chains / step).
    # For N >= 2*B_TILE_MAX the grid naturally has >= 2 steps (v7x megacore).
    b_tile = min(B_TILE_MAX, _round_up(N, 8))
    n_pad = _round_up(N, b_tile)
    G = n_pad // b_tile
    pad_n = n_pad - N

    # Gather chunk: keep ~(2 * t_chunk * b_tile/8) live vregs <= ~32.
    t_chunk = max(4, 128 // b_tile)
    T_pad = _round_up(T, t_chunk)

    lp = jnp.pad(log_probs.astype(jnp.float32),
                 ((0, T_pad - T), (0, pad_n), (0, 0)))
    il = jnp.minimum(il_i32, T)                       # clamp: no OOB time reads
    il = jnp.pad(il, (0, pad_n))
    tl = jnp.pad(tl_i32, (0, pad_n))
    tgt = jnp.pad(targets.astype(jnp.int32), ((0, pad_n), (0, 0)))
    # mask labels beyond each item's true target length to blank (explicit)
    pos = jnp.arange(L_max)[None, :]
    tgt = jnp.where(pos < tl[:, None], tgt, blank)

    # Extended label sequence: blank, l1, blank, l2, ..., blank (padded w/ blank)
    ext = jnp.full((n_pad, S_PAD), blank, dtype=jnp.int32)
    ext = ext.at[:, 1:2 * L_max + 1:2].set(tgt)
    s_idx = jnp.arange(S_PAD)[None, :]
    prev2 = jnp.roll(ext, 2, axis=1)
    skip = ((s_idx % 2 == 1) & (s_idx > 1) & (ext != prev2)
            & (ext != blank)).astype(jnp.int32)

    il2 = il[:, None]                         # (n_pad, 1)
    tl2 = tl[:, None]                         # (n_pad, 1)

    # VMEM budget: emis scratch + double-buffered lp + small label/len blocks.
    # TODO(synk): for speech-scale T on v7x (64 MiB physical VMEM), time-chunk
    # the emis scratch or store it as bf16 instead of raising the limit.
    vmem_needed = (T_pad * b_tile * S_PAD * 4        # emis scratch (f32)
                   + 2 * T_pad * b_tile * C * 4      # lp double buffer
                   + 4 * b_tile * S_PAD * 4          # ext/skip double buffer
                   + 2 * b_tile * 128 * 4            # output double buffer
                   + (2 << 20))                      # headroom
    vmem_limit = int(min(96 << 20, max(32 << 20, vmem_needed)))

    kernel = functools.partial(_ctc_kernel, t_chunk=t_chunk)

    out = pl.pallas_call(
        kernel,
        out_shape=jax.ShapeDtypeStruct((G, b_tile, 128), jnp.float32),
        grid_spec=pltpu.PrefetchScalarGridSpec(
            num_scalar_prefetch=1,
            grid=(G,),
            in_specs=[
                pl.BlockSpec((T_pad, b_tile, C), lambda g, il_s: (0, g, 0)),
                pl.BlockSpec((b_tile, 1), lambda g, il_s: (g, 0)),
                pl.BlockSpec((b_tile, 1), lambda g, il_s: (g, 0)),
                pl.BlockSpec((b_tile, S_PAD), lambda g, il_s: (g, 0)),
                pl.BlockSpec((b_tile, S_PAD), lambda g, il_s: (g, 0)),
            ],
            out_specs=pl.BlockSpec((1, b_tile, 128), lambda g, il_s: (g, 0, 0)),
            scratch_shapes=[pltpu.VMEM((T_pad, b_tile, S_PAD), jnp.float32)],
        ),
        compiler_params=pltpu.CompilerParams(
            dimension_semantics=("parallel",),
            vmem_limit_bytes=vmem_limit),
    )(il, lp, il2, tl2, ext, skip)

    # Per-item losses (only the N real batch items), then nn.CTCLoss batch mean
    # and the focal transform: a few scalar flops -> plain JAX.
    per_item = out[:, :, 0].reshape(n_pad)[:N]
    mean_loss = jnp.mean(per_item)
    focal = mean_loss * (1.0 - jnp.exp(-mean_loss)) ** gamma
    return focal


if __name__ == "__main__":
    key = jax.random.PRNGKey(0)
    k1, k2 = jax.random.split(key)

    T, N, C, L_MAX = 16, 2, NUM_CLASSES, 8

    # nn.CTCLoss expects log-probabilities, so build proper log-softmax values.
    logits = jax.random.normal(k1, (T, N, C), dtype=jnp.float32)
    log_probs = jax.nn.log_softmax(logits, axis=-1)

    targets = jax.random.randint(k2, (N, L_MAX), 0, CTC_BLANK)   # labels 0..9
    input_lengths = jnp.array([T, T - 4], dtype=jnp.int32)
    target_lengths = jnp.array([L_MAX, L_MAX - 3], dtype=jnp.int32)

    out = focal_ctc_loss(log_probs, targets, input_lengths, target_lengths,
                         gamma=2.0)
    jax.block_until_ready(out)
    print("KERNEL_OK")
</pallas_src>

<mosaic_0001>
module attributes {stable_mosaic.version = 11 : i64} {
  func.func @_ctc_kernel(%arg0: i32, %arg1: memref<8xi32, #tpu.memory_space<smem>>, %arg2: memref<16x8x11xf32, #tpu.memory_space<vmem>>, %arg3: memref<8x1xi32, #tpu.memory_space<vmem>>, %arg4: memref<8x1xi32, #tpu.memory_space<vmem>>, %arg5: memref<8x128xi32, #tpu.memory_space<vmem>>, %arg6: memref<8x128xi32, #tpu.memory_space<vmem>>, %arg7: memref<1x8x128xf32, #tpu.memory_space<vmem>>, %arg8: memref<16x8x128xf32, #tpu.memory_space<vmem>>) attributes {dimension_semantics = [#tpu.dimension_semantics<parallel>], iteration_bounds = array<i64: 1>, scalar_prefetch = 1 : i64, scratch_operands = 1 : i64, tpu.core_type = #tpu.core_type<tc>, window_params = [{transform_indices = @transform_0, window_bounds = array<i64: 16, 8, 11>}, {transform_indices = @transform_1, window_bounds = array<i64: 8, 1>}, {transform_indices = @transform_2, window_bounds = array<i64: 8, 1>}, {transform_indices = @transform_3, window_bounds = array<i64: 8, 128>}, {transform_indices = @transform_4, window_bounds = array<i64: 8, 128>}, {transform_indices = @transform_5, window_bounds = array<i64: 1, 8, 128>}]} {
    %c0 = arith.constant 0 : index
    %c0_0 = arith.constant 0 : index
    %0 = vector.load %arg5[%c0, %c0_0] : memref<8x128xi32, #tpu.memory_space<vmem>>, vector<8x128xi32>
    %c0_1 = arith.constant 0 : index
    %c0_2 = arith.constant 0 : index
    %1 = vector.load %arg3[%c0_1, %c0_2] : memref<8x1xi32, #tpu.memory_space<vmem>>, vector<8x1xi32>
    %c0_3 = arith.constant 0 : index
    %c0_4 = arith.constant 0 : index
    %2 = vector.load %arg4[%c0_3, %c0_4] : memref<8x1xi32, #tpu.memory_space<vmem>>, vector<8x1xi32>
    %3 = vector.shape_cast %0 : vector<8x128xi32> to vector<1x8x128xi32>
    %c0_i32 = arith.constant 0 : i32
    %c1_i32 = arith.constant 1 : i32
    %4 = arith.muli %c0_i32, %c1_i32 : i32
    %c0_i32_5 = arith.constant 0 : i32
    %5 = arith.addi %c0_i32_5, %4 : i32
    %c16_i32 = arith.constant 16 : i32
    %6 = arith.muli %5, %c16_i32 : i32
    %7 = tpu.assume_multiple %6, 16 : i32
    %8 = arith.index_cast %7 : i32 to index
    %c0_6 = arith.constant 0 : index
    %c0_7 = arith.constant 0 : index
    %9 = vector.load %arg2[%8, %c0_6, %c0_7] : memref<16x8x11xf32, #tpu.memory_space<vmem>>, vector<16x8x11xf32>
    %cst = arith.constant 0.000000e+00 : f32
    %10 = vector.broadcast %cst : f32 to vector<16x8x128xf32>
    %c0_i32_8 = arith.constant 0 : i32
    %11 = vector.broadcast %c0_i32_8 : i32 to vector<1x8x128xi32>
    %12 = arith.cmpi eq, %3, %11 : vector<1x8x128xi32>
    %13 = vector.extract_strided_slice %9 {offsets = [0, 0, 0], sizes = [16, 8, 1], strides = [1, 1, 1]} : vector<16x8x11xf32> to vector<16x8x1xf32>
    %14 = vector.shape_cast %12 : vector<1x8x128xi1> to vector<1x8x128xi1>
    %15 = vector.broadcast %14 : vector<1x8x128xi1> to vector<16x8x128xi1>
    %16 = vector.shape_cast %13 : vector<16x8x1xf32> to vector<16x8x1xf32>
    %17 = vector.broadcast %16 : vector<16x8x1xf32> to vector<16x8x128xf32>
    %18 = arith.select %15, %17, %10 : vector<16x8x128xi1>, vector<16x8x128xf32>
    %c1_i32_9 = arith.constant 1 : i32
    %19 = vector.broadcast %c1_i32_9 : i32 to vector<1x8x128xi32>
    %20 = arith.cmpi eq, %3, %19 : vector<1x8x128xi32>
    %21 = vector.extract_strided_slice %9 {offsets = [0, 0, 1], sizes = [16, 8, 1], strides = [1, 1, 1]} : vector<16x8x11xf32> to vector<16x8x1xf32>
    %22 = vector.shape_cast %20 : vector<1x8x128xi1> to vector<1x8x128xi1>
    %23 = vector.broadcast %22 : vector<1x8x128xi1> to vector<16x8x128xi1>
    %24 = vector.shape_cast %21 : vector<16x8x1xf32> to vector<16x8x1xf32>
    %25 = vector.broadcast %24 : vector<16x8x1xf32> to vector<16x8x128xf32>
    %26 = arith.select %23, %25, %18 : vector<16x8x128xi1>, vector<16x8x128xf32>
    %c2_i32 = arith.constant 2 : i32
    %27 = vector.broadcast %c2_i32 : i32 to vector<1x8x128xi32>
    %28 = arith.cmpi eq, %3, %27 : vector<1x8x128xi32>
    %29 = vector.extract_strided_slice %9 {offsets = [0, 0, 2], sizes = [16, 8, 1], strides = [1, 1, 1]} : vector<16x8x11xf32> to vector<16x8x1xf32>
    %30 = vector.shape_cast %28 : vector<1x8x128xi1> to vector<1x8x128xi1>
    %31 = vector.broadcast %30 : vector<1x8x128xi1> to vector<16x8x128xi1>
    %32 = vector.shape_cast %29 : vector<16x8x1xf32> to vector<16x8x1xf32>
    %33 = vector.broadcast %32 : vector<16x8x1xf32> to vector<16x8x128xf32>
    %34 = arith.select %31, %33, %26 : vector<16x8x128xi1>, vector<16x8x128xf32>
    %c3_i32 = arith.constant 3 : i32
    %35 = vector.broadcast %c3_i32 : i32 to vector<1x8x128xi32>
    %36 = arith.cmpi eq, %3, %35 : vector<1x8x128xi32>
    %37 = vector.extract_strided_slice %9 {offsets = [0, 0, 3], sizes = [16, 8, 1], strides = [1, 1, 1]} : vector<16x8x11xf32> to vector<16x8x1xf32>
    %38 = vector.shape_cast %36 : vector<1x8x128xi1> to vector<1x8x128xi1>
    %39 = vector.broadcast %38 : vector<1x8x128xi1> to vector<16x8x128xi1>
    %40 = vector.shape_cast %37 : vector<16x8x1xf32> to vector<16x8x1xf32>
    %41 = vector.broadcast %40 : vector<16x8x1xf32> to vector<16x8x128xf32>
    %42 = arith.select %39, %41, %34 : vector<16x8x128xi1>, vector<16x8x128xf32>
    %c4_i32 = arith.constant 4 : i32
    %43 = vector.broadcast %c4_i32 : i32 to vector<1x8x128xi32>
    %44 = arith.cmpi eq, %3, %43 : vector<1x8x128xi32>
    %45 = vector.extract_strided_slice %9 {offsets = [0, 0, 4], sizes = [16, 8, 1], strides = [1, 1, 1]} : vector<16x8x11xf32> to vector<16x8x1xf32>
    %46 = vector.shape_cast %44 : vector<1x8x128xi1> to vector<1x8x128xi1>
    %47 = vector.broadcast %46 : vector<1x8x128xi1> to vector<16x8x128xi1>
    %48 = vector.shape_cast %45 : vector<16x8x1xf32> to vector<16x8x1xf32>
    %49 = vector.broadcast %48 : vector<16x8x1xf32> to vector<16x8x128xf32>
    %50 = arith.select %47, %49, %42 : vector<16x8x128xi1>, vector<16x8x128xf32>
    %c5_i32 = arith.constant 5 : i32
    %51 = vector.broadcast %c5_i32 : i32 to vector<1x8x128xi32>
    %52 = arith.cmpi eq, %3, %51 : vector<1x8x128xi32>
    %53 = vector.extract_strided_slice %9 {offsets = [0, 0, 5], sizes = [16, 8, 1], strides = [1, 1, 1]} : vector<16x8x11xf32> to vector<16x8x1xf32>
    %54 = vector.shape_cast %52 : vector<1x8x128xi1> to vector<1x8x128xi1>
    %55 = vector.broadcast %54 : vector<1x8x128xi1> to vector<16x8x128xi1>
    %56 = vector.shape_cast %53 : vector<16x8x1xf32> to vector<16x8x1xf32>
    %57 = vector.broadcast %56 : vector<16x8x1xf32> to vector<16x8x128xf32>
    %58 = arith.select %55, %57, %50 : vector<16x8x128xi1>, vector<16x8x128xf32>
    %c6_i32 = arith.constant 6 : i32
    %59 = vector.broadcast %c6_i32 : i32 to vector<1x8x128xi32>
    %60 = arith.cmpi eq, %3, %59 : vector<1x8x128xi32>
    %61 = vector.extract_strided_slice %9 {offsets = [0, 0, 6], sizes = [16, 8, 1], strides = [1, 1, 1]} : vector<16x8x11xf32> to vector<16x8x1xf32>
    %62 = vector.shape_cast %60 : vector<1x8x128xi1> to vector<1x8x128xi1>
    %63 = vector.broadcast %62 : vector<1x8x128xi1> to vector<16x8x128xi1>
    %64 = vector.shape_cast %61 : vector<16x8x1xf32> to vector<16x8x1xf32>
    %65 = vector.broadcast %64 : vector<16x8x1xf32> to vector<16x8x128xf32>
    %66 = arith.select %63, %65, %58 : vector<16x8x128xi1>, vector<16x8x128xf32>
    %c7_i32 = arith.constant 7 : i32
    %67 = vector.broadcast %c7_i32 : i32 to vector<1x8x128xi32>
    %68 = arith.cmpi eq, %3, %67 : vector<1x8x128xi32>
    %69 = vector.extract_strided_slice %9 {offsets = [0, 0, 7], sizes = [16, 8, 1], strides = [1, 1, 1]} : vector<16x8x11xf32> to vector<16x8x1xf32>
    %70 = vector.shape_cast %68 : vector<1x8x128xi1> to vector<1x8x128xi1>
    %71 = vector.broadcast %70 : vector<1x8x128xi1> to vector<16x8x128xi1>
    %72 = vector.shape_cast %69 : vector<16x8x1xf32> to vector<16x8x1xf32>
    %73 = vector.broadcast %72 : vector<16x8x1xf32> to vector<16x8x128xf32>
    %74 = arith.select %71, %73, %66 : vector<16x8x128xi1>, vector<16x8x128xf32>
    %c8_i32 = arith.constant 8 : i32
    %75 = vector.broadcast %c8_i32 : i32 to vector<1x8x128xi32>
    %76 = arith.cmpi eq, %3, %75 : vector<1x8x128xi32>
    %77 = vector.extract_strided_slice %9 {offsets = [0, 0, 8], sizes = [16, 8, 1], strides = [1, 1, 1]} : vector<16x8x11xf32> to vector<16x8x1xf32>
    %78 = vector.shape_cast %76 : vector<1x8x128xi1> to vector<1x8x128xi1>
    %79 = vector.broadcast %78 : vector<1x8x128xi1> to vector<16x8x128xi1>
    %80 = vector.shape_cast %77 : vector<16x8x1xf32> to vector<16x8x1xf32>
    %81 = vector.broadcast %80 : vector<16x8x1xf32> to vector<16x8x128xf32>
    %82 = arith.select %79, %81, %74 : vector<16x8x128xi1>, vector<16x8x128xf32>
    %c9_i32 = arith.constant 9 : i32
    %83 = vector.broadcast %c9_i32 : i32 to vector<1x8x128xi32>
    %84 = arith.cmpi eq, %3, %83 : vector<1x8x128xi32>
    %85 = vector.extract_strided_slice %9 {offsets = [0, 0, 9], sizes = [16, 8, 1], strides = [1, 1, 1]} : vector<16x8x11xf32> to vector<16x8x1xf32>
    %86 = vector.shape_cast %84 : vector<1x8x128xi1> to vector<1x8x128xi1>
    %87 = vector.broadcast %86 : vector<1x8x128xi1> to vector<16x8x128xi1>
    %88 = vector.shape_cast %85 : vector<16x8x1xf32> to vector<16x8x1xf32>
    %89 = vector.broadcast %88 : vector<16x8x1xf32> to vector<16x8x128xf32>
    %90 = arith.select %87, %89, %82 : vector<16x8x128xi1>, vector<16x8x128xf32>
    %c10_i32 = arith.constant 10 : i32
    %91 = vector.broadcast %c10_i32 : i32 to vector<1x8x128xi32>
    %92 = arith.cmpi eq, %3, %91 : vector<1x8x128xi32>
    %93 = vector.extract_strided_slice %9 {offsets = [0, 0, 10], sizes = [16, 8, 1], strides = [1, 1, 1]} : vector<16x8x11xf32> to vector<16x8x1xf32>
    %94 = vector.shape_cast %92 : vector<1x8x128xi1> to vector<1x8x128xi1>
    %95 = vector.broadcast %94 : vector<1x8x128xi1> to vector<16x8x128xi1>
    %96 = vector.shape_cast %93 : vector<16x8x1xf32> to vector<16x8x1xf32>
    %97 = vector.broadcast %96 : vector<16x8x1xf32> to vector<16x8x128xf32>
    %98 = arith.select %95, %97, %90 : vector<16x8x128xi1>, vector<16x8x128xf32>
    %99 = arith.index_cast %7 : i32 to index
    %c0_10 = arith.constant 0 : index
    %c0_11 = arith.constant 0 : index
    %100 = vector.load %arg8[%99, %c0_10, %c0_11] : memref<16x8x128xf32, #tpu.memory_space<vmem>>, vector<16x8x128xf32>
    tpu.vector_store %arg8[%99, %c0_10, %c0_11], %98 {strides = array<i32>} : memref<16x8x128xf32, #tpu.memory_space<vmem>>, vector<16x8x128xf32>,
    %c1_i32_12 = arith.constant 1 : i32
    %101 = tpu.iota {dimensions = array<i32: 1>} : vector<8x128xi32>
    %cst_13 = arith.constant -1.000000e+30 : f32
    %102 = vector.broadcast %cst_13 : f32 to vector<8x128xf32>
    %c1_i32_14 = arith.constant 1 : i32
    %103 = vector.broadcast %c1_i32_14 : i32 to vector<8x128xi32>
    %104 = arith.cmpi sge, %101, %103 : vector<8x128xi32>
    %c0_15 = arith.constant 0 : index
    %c0_16 = arith.constant 0 : index
    %105 = vector.load %arg6[%c0_15, %c0_16] : memref<8x128xi32, #tpu.memory_space<vmem>>, vector<8x128xi32>
    %c0_i32_17 = arith.constant 0 : i32
    %106 = vector.broadcast %c0_i32_17 : i32 to vector<8x128xi32>
    %107 = arith.cmpi sgt, %105, %106 : vector<8x128xi32>
    %c0_18 = arith.constant 0 : index
    %c0_19 = arith.constant 0 : index
    %c0_20 = arith.constant 0 : index
    %108 = vector.load %arg8[%c0_18, %c0_19, %c0_20] : memref<16x8x128xf32, #tpu.memory_space<vmem>>, vector<1x8x128xf32>
    %109 = vector.shape_cast %108 : vector<1x8x128xf32> to vector<8x128xf32>
    %c0_i32_21 = arith.constant 0 : i32
    %110 = vector.broadcast %c0_i32_21 : i32 to vector<8x128xi32>
    %111 = arith.cmpi eq, %101, %110 : vector<8x128xi32>
    %c1_i32_22 = arith.constant 1 : i32
    %112 = vector.broadcast %c1_i32_22 : i32 to vector<8x128xi32>
    %113 = arith.cmpi eq, %101, %112 : vector<8x128xi32>
    %c0_i32_23 = arith.constant 0 : i32
    %114 = vector.broadcast %c0_i32_23 : i32 to vector<8x1xi32>
    %115 = arith.cmpi sgt, %2, %114 : vector<8x1xi32>
    %116 = vector.broadcast %115 : vector<8x1xi1> to vector<8x128xi1>
    %117 = arith.andi %113, %116 : vector<8x128xi1>
    %118 = arith.ori %111, %117 : vector<8x128xi1>
    %119 = arith.select %118, %109, %102 : vector<8x128xi1>, vector<8x128xf32>
    %c8_i32_24 = arith.constant 8 : i32
    %120 = arith.muli %arg0, %c8_i32_24 : i32
    %121 = arith.index_cast %120 : i32 to index
    %122 = memref.load %arg1[%121] : memref<8xi32, #tpu.memory_space<smem>>
    %c1_i32_25 = arith.constant 1 : i32
    %123 = arith.addi %120, %c1_i32_25 : i32
    %124 = arith.index_cast %123 : i32 to index
    %125 = memref.load %arg1[%124] : memref<8xi32, #tpu.memory_space<smem>>
    %126 = arith.maxsi %122, %125 : i32
    %c2_i32_26 = arith.constant 2 : i32
    %127 = arith.addi %120, %c2_i32_26 : i32
    %128 = arith.index_cast %127 : i32 to index
    %129 = memref.load %arg1[%128] : memref<8xi32, #tpu.memory_space<smem>>
    %130 = arith.maxsi %126, %129 : i32
    %c3_i32_27 = arith.constant 3 : i32
    %131 = arith.addi %120, %c3_i32_27 : i32
    %132 = arith.index_cast %131 : i32 to index
    %133 = memref.load %arg1[%132] : memref<8xi32, #tpu.memory_space<smem>>
    %134 = arith.maxsi %130, %133 : i32
    %c4_i32_28 = arith.constant 4 : i32
    %135 = arith.addi %120, %c4_i32_28 : i32
    %136 = arith.index_cast %135 : i32 to index
    %137 = memref.load %arg1[%136] : memref<8xi32, #tpu.memory_space<smem>>
    %138 = arith.maxsi %134, %137 : i32
    %c5_i32_29 = arith.constant 5 : i32
    %139 = arith.addi %120, %c5_i32_29 : i32
    %140 = arith.index_cast %139 : i32 to index
    %141 = memref.load %arg1[%140] : memref<8xi32, #tpu.memory_space<smem>>
    %142 = arith.maxsi %138, %141 : i32
    %c6_i32_30 = arith.constant 6 : i32
    %143 = arith.addi %120, %c6_i32_30 : i32
    %144 = arith.index_cast %143 : i32 to index
    %145 = memref.load %arg1[%144] : memref<8xi32, #tpu.memory_space<smem>>
    %146 = arith.maxsi %142, %145 : i32
    %c7_i32_31 = arith.constant 7 : i32
    %147 = arith.addi %120, %c7_i32_31 : i32
    %148 = arith.index_cast %147 : i32 to index
    %149 = memref.load %arg1[%148] : memref<8xi32, #tpu.memory_space<smem>>
    %150 = arith.maxsi %146, %149 : i32
    %c16_i32_32 = arith.constant 16 : i32
    %151 = arith.minsi %150, %c16_i32_32 : i32
    %c1_i32_33 = arith.constant 1 : i32
    %152 = arith.subi %151, %c1_i32_33 : i32
    %153 = arith.addi %c1_i32_33, %152 : i32
    %c1_i32_34 = arith.constant 1 : i32
    %154 = scf.for %arg9 = %c1_i32_33 to %153 step %c1_i32_34 iter_args(%arg10 = %119) -> (vector<8x128xf32>)  : i32 {
      %c1_i32_46 = arith.constant 1 : i32
      %189 = tpu.dynamic_rotate %arg10 by %c1_i32_46 dim 1 : vector<8x128xf32>, i32 -> vector<8x128xf32>
      %190 = arith.select %104, %189, %102 : vector<8x128xi1>, vector<8x128xf32>
      %c2_i32_47 = arith.constant 2 : i32
      %191 = tpu.dynamic_rotate %arg10 by %c2_i32_47 dim 1 : vector<8x128xf32>, i32 -> vector<8x128xf32>
      %192 = arith.select %107, %191, %102 : vector<8x128xi1>, vector<8x128xf32>
      %193 = arith.maximumf %arg10, %190 : vector<8x128xf32>
      %194 = arith.minimumf %arg10, %190 : vector<8x128xf32>
      %195 = arith.maximumf %193, %192 : vector<8x128xf32>
      %196 = arith.minimumf %193, %192 : vector<8x128xf32>
      %197 = arith.subf %194, %195 : vector<8x128xf32>
      %198 = math.exp %197 : vector<8x128xf32>
      %cst_48 = arith.constant 1.000000e+00 : f32
      %199 = vector.broadcast %cst_48 : f32 to vector<8x128xf32>
      %200 = arith.addf %199, %198 : vector<8x128xf32>
      %201 = arith.subf %196, %195 : vector<8x128xf32>
      %202 = math.exp %201 : vector<8x128xf32>
      %203 = arith.addf %200, %202 : vector<8x128xf32>
      %204 = math.log %203 : vector<8x128xf32>
      %205 = arith.addf %195, %204 : vector<8x128xf32>
      %206 = arith.index_cast %arg9 : i32 to index
      %c0_49 = arith.constant 0 : index
      %c0_50 = arith.constant 0 : index
      %207 = vector.load %arg8[%206, %c0_49, %c0_50] : memref<16x8x128xf32, #tpu.memory_space<vmem>>, vector<1x8x128xf32>
      %208 = vector.shape_cast %207 : vector<1x8x128xf32> to vector<8x128xf32>
      %209 = arith.addf %208, %205 : vector<8x128xf32>
      %210 = vector.broadcast %arg9 : i32 to vector<8x1xi32>
      %211 = arith.cmpi slt, %210, %1 : vector<8x1xi32>
      %212 = vector.shape_cast %211 : vector<8x1xi1> to vector<8x1xi1>
      %213 = vector.broadcast %212 : vector<8x1xi1> to vector<8x128xi1>
      %214 = arith.select %213, %209, %arg10 : vector<8x128xi1>, vector<8x128xf32>
      scf.yield %214 : vector<8x128xf32>
    }
    %c2_i32_35 = arith.constant 2 : i32
    %155 = vector.broadcast %c2_i32_35 : i32 to vector<8x1xi32>
    %156 = arith.muli %155, %2 : vector<8x1xi32>
    %157 = vector.broadcast %156 : vector<8x1xi32> to vector<8x128xi32>
    %158 = arith.cmpi eq, %101, %157 : vector<8x128xi32>
    %c1_i32_36 = arith.constant 1 : i32
    %159 = vector.broadcast %c1_i32_36 : i32 to vector<8x1xi32>
    %160 = arith.subi %156, %159 : vector<8x1xi32>
    %161 = vector.broadcast %160 : vector<8x1xi32> to vector<8x128xi32>
    %162 = arith.cmpi eq, %101, %161 : vector<8x128xi32>
    %163 = arith.ori %158, %162 : vector<8x128xi1>
    %164 = arith.select %163, %154, %102 : vector<8x128xi1>, vector<8x128xf32>
    %cst_37 = arith.constant dense<0xFF800000> : vector<8xf32>
    %165 = vector.multi_reduction <maximumf>, %164, %cst_37 [1] : vector<8x128xf32> to vector<8xf32>
    %166 = vector.shape_cast %165 : vector<8xf32> to vector<8x1xf32>
    %167 = vector.broadcast %166 : vector<8x1xf32> to vector<8x128xf32>
    %168 = arith.subf %164, %167 : vector<8x128xf32>
    %169 = math.exp %168 : vector<8x128xf32>
    %cst_38 = arith.constant dense<0.000000e+00> : vector<8xf32>
    %170 = vector.multi_reduction <add>, %169, %cst_38 [1] : vector<8x128xf32> to vector<8xf32>
    %171 = vector.shape_cast %170 : vector<8xf32> to vector<8x1xf32>
    %172 = math.log %171 : vector<8x1xf32>
    %173 = arith.addf %166, %172 : vector<8x1xf32>
    %cst_39 = arith.constant 0.000000e+00 : f32
    %174 = vector.broadcast %cst_39 : f32 to vector<8x1xf32>
    %175 = arith.subf %174, %173 : vector<8x1xf32>
    %cst_40 = arith.constant 5.000000e+29 : f32
    %176 = vector.broadcast %cst_40 : f32 to vector<8x1xf32>
    %177 = arith.cmpf oge, %175, %176 : vector<8x1xf32>
    %cst_41 = arith.constant 0.000000e+00 : f32
    %178 = vector.broadcast %cst_41 : f32 to vector<8x1xf32>
    %179 = arith.select %177, %178, %175 : vector<8x1xi1>, vector<8x1xf32>
    %c1_i32_42 = arith.constant 1 : i32
    %180 = vector.broadcast %c1_i32_42 : i32 to vector<8x1xi32>
    %181 = arith.maxsi %2, %180 : vector<8x1xi32>
    %182 = arith.sitofp %181 : vector<8x1xi32> to vector<8x1xf32>
    %183 = arith.divf %179, %182 : vector<8x1xf32>
    %184 = vector.shape_cast %183 : vector<8x1xf32> to vector<8x1xf32>
    %185 = vector.broadcast %184 : vector<8x1xf32> to vector<8x128xf32>
    %c0_43 = arith.constant 0 : index
    %c0_44 = arith.constant 0 : index
    %c0_45 = arith.constant 0 : index
    %186 = vector.load %arg7[%c0_43, %c0_44, %c0_45] : memref<1x8x128xf32, #tpu.memory_space<vmem>>, vector<1x8x128xf32>
    %187 = vector.shape_cast %186 : vector<1x8x128xf32> to vector<8x128xf32>
    %188 = vector.shape_cast %185 : vector<8x128xf32> to vector<1x8x128xf32>
    tpu.vector_store %arg7[%c0_43, %c0_44, %c0_45], %188 {strides = array<i32>} : memref<1x8x128xf32, #tpu.memory_space<vmem>>, vector<1x8x128xf32>,
    return
  }
  func.func @transform_0(%arg0: i32, %arg1: memref<8xi32, #tpu.memory_space<smem>>) -> (i32, i32, i32) {
    %c0_i32 = arith.constant 0 : i32
    %c0_i32_0 = arith.constant 0 : i32
    %c0_i32_1 = arith.constant 0 : i32
    return %c0_i32, %arg0, %c0_i32_0 : i32, i32, i32
  }
  func.func @transform_1(%arg0: i32, %arg1: memref<8xi32, #tpu.memory_space<smem>>) -> (i32, i32) {
    %c0_i32 = arith.constant 0 : i32
    %c0_i32_0 = arith.constant 0 : i32
    return %arg0, %c0_i32 : i32, i32
  }
  func.func @transform_2(%arg0: i32, %arg1: memref<8xi32, #tpu.memory_space<smem>>) -> (i32, i32) {
    %c0_i32 = arith.constant 0 : i32
    %c0_i32_0 = arith.constant 0 : i32
    return %arg0, %c0_i32 : i32, i32
  }
  func.func @transform_3(%arg0: i32, %arg1: memref<8xi32, #tpu.memory_space<smem>>) -> (i32, i32) {
    %c0_i32 = arith.constant 0 : i32
    %c0_i32_0 = arith.constant 0 : i32
    return %arg0, %c0_i32 : i32, i32
  }
  func.func @transform_4(%arg0: i32, %arg1: memref<8xi32, #tpu.memory_space<smem>>) -> (i32, i32) {
    %c0_i32 = arith.constant 0 : i32
    %c0_i32_0 = arith.constant 0 : i32
    return %arg0, %c0_i32 : i32, i32
  }
  func.func @transform_5(%arg0: i32, %arg1: memref<8xi32, #tpu.memory_space<smem>>) -> (i32, i32, i32) {
    %c0_i32 = arith.constant 0 : i32
    %c0_i32_0 = arith.constant 0 : i32
    %c0_i32_1 = arith.constant 0 : i32
    return %arg0, %c0_i32, %c0_i32_0 : i32, i32, i32
  }
}

</mosaic_0001>

<bundles_post_ra>
// kernel: tpu_custom_call.1
= control target key start
LH: loop header
LB: loop body
LE: loop exit
PB: predicated region body
PF: predicated region fallthrough
CT: control target
= control target key end

     0   :  { %s1330_s24 = smov [#allocation4]   ;;  %s2476_s0 = inlined_call_operand.vmem [shape: s32[8], index: 0, kind: input, shape index: {}]   ;;  %s2477_s1 = inlined_call_operand.vmem [shape: f32[16,8,11], index: 1, kind: input, shape index: {}]   ;;  %s2478_s2 = inlined_call_operand.vmem [shape: s32[8,1], index: 2, kind: input, shape index: {}]   ;;  %s2479_s3 = inlined_call_operand.vmem [shape: s32[8,1], index: 3, kind: input, shape index: {}]   ;;  %s2480_s4 = inlined_call_operand.vmem [shape: s32[8,128], index: 4, kind: input, shape index: {}]   ;;  %s2481_s5 = inlined_call_operand.vmem [shape: s32[8,128], index: 5, kind: input, shape index: {}]   ;;  %s2482_s6 = inlined_call_operand.hbm [shape: f32[1,8,128], index: 6, kind: output, shape index: {}]  }
   0x1   :  { %s12_s23 = sshll.u32 %s2476_s0, 4  ;;  %s13_s23 = int_to_ptr.vmem [resolvable:$true] %s12_s23 }
   0x2   :  { %15 = dma.vmem_to_smem %s13_s23, 16, %s1330_s24, [#allocation3] }
   0x3   :  { %1314 = dma.done.wait [#allocation3], 16 }
   0x4   :  { %1315 = vsyncadd [#allocation3], 4294967280 }
   0x5   :  { %18 = sfence }
   0x6   :  { %v1387_v0 = vld [vmem:[%s2477_s1 + $0x20] sm:$0xff]  ;;  %v1392_v1 = vld [vmem:[%s2477_s1 + $0x10] sm:$0xff]  ;;  %v1331_v2 = vmov 1   ;;  %v2483_v3 = vmov 0  }
   0x7   :  { %1218 = vset.pattern.permute.xlu0 %v1331_v2  ;;  %1215 = vset.pattern.permute.xlu2 %v2483_v3 }
   0x8   :  { %1214 = vset.pattern.permute.xlu1 %v2483_v3  ;;  %76 = vperm.xlu2 %1215, %v1387_v0  }
   0x9   :  { %162 = vperm.xlu0 %1218, %v1392_v1   ;;  %66 = vperm.xlu1 %1214, %v1392_v1  }
   0xa   :  { %19 = vsyncpa [#allocation6], 0  ;;  %v1402_v4 = vld [vmem:[%s2477_s1 + $0x28] sm:$0xff]  ;;  %v1407_v5 = vld [vmem:[%s2477_s1 + $0x38] sm:$0xff]  ;;  %v1333_v13 = vmov 2   ;;  %v1334_v18 = vmov 3  }
   0xb   :  { %v1412_v6 = vld [vmem:[%s2477_s1 + $0x18] sm:$0xff]  ;;  %v1420_v7 = vld [vmem:[%s2477_s1 + $0x40] sm:$0xff]  ;;  %v1425_v8 = vld [vmem:[%s2477_s1 + $0x50] sm:$0xff]  ;;  %v1335_v25 = vmov 4   ;;  %v1336_v38 = vmov 5   ;;  %v2486_v54 = vmov 6  }
   0xc   :  { %v1433_v9 = vld [vmem:[%s2477_s1 + $0x58] sm:$0xff]  ;;  %v1438_v10 = vld [vmem:[%s2477_s1 + $0x68] sm:$0xff]  ;;  %v1446_v11 = vld [vmem:[%s2477_s1 + $0x70] sm:$0xff]  ;;  %s1161_s10 = sld [smem:[#allocation4 + $0x1]] }
   0xd   :  { %v1451_v12 = vld [vmem:[%s2477_s1] sm:$0xff]  ;;  %v1459_v14 = vld [vmem:[%s2477_s1 + $0x8] sm:$0xff]  ;;  %v1470_v15 = vld [vmem:[%s2477_s1 + $0x30] sm:$0xff]  ;;  %s1162_s11 = sld [smem:[#allocation4 + $0x2]] }
   0xe   :  { %v1478_v16 = vld [vmem:[%s2477_s1 + $0x48] sm:$0xff]  ;;  %v1486_v17 = vld [vmem:[%s2477_s1 + $0x60] sm:$0xff]  ;;  %v1494_v19 = vld [vmem:[%s2477_s1 + $0x78] sm:$0xff]  ;;  %s1163_s12 = sld [smem:[#allocation4 + $0x3]] }
   0xf   :  { %2496 = vst [vmem:[#allocation9_spill] sm:$0xff] %v1486_v17  ;;  %v1615_v60 = vld [vmem:[%s2480_s4] sm:$0xff]  ;;  %s1164_s13 = sld [smem:[#allocation4 + $0x4]] }
  0x10   :  { %81 = vperm.xlu2 %1215, %v1402_v4   ;;  %2497 = vst [vmem:[#allocation10_spill] sm:$0xff] %v1494_v19  ;;  %vm51_vm0 = vcmp.eq.s32.totalorder %v1615_v60, 0  ;;  %vm150_vm1 = vcmp.eq.s32.totalorder %v1615_v60, 1  ;;  %vm233_vm2 = vcmp.eq.s32.totalorder %v1615_v60, 2  ;;  %vm316_vm3 = vcmp.eq.s32.totalorder %v1615_v60, 3  ;;  %s2168_s14 = sld [smem:[#allocation4 + $0x5]] }
  0x11   :  { %182 = vperm.xlu0 %1218, %v1407_v5   ;;  %71 = vperm.xlu1 %1214, %v1412_v6   ;;  %vm399_vm4 = vcmp.eq.s32.totalorder %v1615_v60, 4  ;;  %vm482_vm5 = vcmp.eq.s32.totalorder %v1615_v60, 5  ;;  %vm565_vm6 = vcmp.eq.s32.totalorder %v1615_v60, 6  ;;  %vm648_vm8 = vcmp.eq.s32.totalorder %v1615_v60, 7  ;;  %s2186_s15 = sld [smem:[#allocation4 + $0x6]] }
  0x12   :  { %vm731_vm9 = vcmp.eq.s32.totalorder %v1615_v60, 8  ;;  %vm814_vm10 = vcmp.eq.s32.totalorder %v1615_v60, 9  ;;  %s1167_s16 = sld [smem:[#allocation4 + $0x7]]  ;;  %vm897_vm12 = vcmp.eq.s32.totalorder %v1615_v60, 10 }
  0x18   :  { %96 = vperm.xlu2 %1215, %v1420_v7  }
  0x19   :  { %194 = vperm.xlu0 %1218, %v1425_v8   ;;  %91 = vperm.xlu1 %1214, %v1407_v5  }
  0x20   :  { %111 = vperm.xlu2 %1215, %v1433_v9  }
  0x21   :  { %206 = vperm.xlu0 %1218, %v1438_v10   ;;  %106 = vperm.xlu1 %1214, %v1425_v8  }
  0x28   :  { %126 = vperm.xlu2 %1215, %v1446_v11  }
  0x29   :  { %1219 = vset.pattern.permute.xlu0 %v1333_v13  ;;  %121 = vperm.xlu1 %1214, %v1438_v10  }
  0x2a   :  { %237 = vperm.xlu0 %1219, %v1451_v12  }
  0x30   :  { %1217 = vset.pattern.permute.xlu2 %v1331_v2 }
  0x31   :  { %1216 = vset.pattern.permute.xlu1 %v1331_v2  ;;  %158 = vperm.xlu2 %1217, %v1459_v14  }
  0x32   :  { %257 = vperm.xlu0 %1219, %v1402_v4   ;;  %154 = vperm.xlu1 %1216, %v1451_v12  }
  0x39   :  { %170 = vperm.xlu2 %1217, %v1387_v0  }
  0x3a   :  { %269 = vperm.xlu0 %1219, %v1420_v7   ;;  %166 = vperm.xlu1 %1216, %v1412_v6  }
  0x41   :  { %178 = vperm.xlu2 %1217, %v1470_v15  }
  0x42   :  { %281 = vperm.xlu0 %1219, %v1433_v9   ;;  %174 = vperm.xlu1 %1216, %v1402_v4  }
  0x49   :  { %190 = vperm.xlu2 %1217, %v1478_v16  }
  0x4a   :  { %293 = vperm.xlu0 %1219, %v1446_v11   ;;  %186 = vperm.xlu1 %1216, %v1420_v7  }
  0x51   :  { %202 = vperm.xlu2 %1217, %v1486_v17  }
  0x52   :  { %1223 = vset.pattern.permute.xlu0 %v1334_v18  ;;  %198 = vperm.xlu1 %1216, %v1433_v9  }
  0x53   :  { %324 = vperm.xlu0 %1223, %v1459_v14  }
  0x59   :  { %214 = vperm.xlu2 %1217, %v1494_v19  }
  0x5a   :  { %210 = vperm.xlu1 %1216, %v1446_v11  }
  0x5b   :  { %344 = vperm.xlu0 %1223, %v1470_v15  }
  0x61   :  { %1221 = vset.pattern.permute.xlu2 %v1333_v13 }
  0x62   :  { %1220 = vset.pattern.permute.xlu1 %v1333_v13  ;;  %v1499_v20 = vpop.permute.xlu2 %76  ;;  %245 = vperm.xlu2 %1221, %v1392_v1  }
  0x63   :  { %356 = vperm.xlu0 %1223, %v1478_v16   ;;  %241 = vperm.xlu1 %1220, %v1459_v14  }
  0x6a   :  { %v1504_v21 = vpop.permute.xlu2 %81  ;;  %253 = vperm.xlu2 %1221, %v1387_v0  }
  0x6b   :  { %368 = vperm.xlu0 %1223, %v1486_v17   ;;  %249 = vperm.xlu1 %1220, %v1412_v6  }
  0x72   :  { %v1509_v22 = vpop.permute.xlu2 %96  ;;  %265 = vperm.xlu2 %1221, %v1407_v5  }
  0x73   :  { %380 = vperm.xlu0 %1223, %v1494_v19   ;;  %261 = vperm.xlu1 %1220, %v1470_v15  }
  0x7a   :  { %v1514_v23 = vpop.permute.xlu2 %111  ;;  %277 = vperm.xlu2 %1221, %v1425_v8  }
  0x7b   :  { %v1517_v24 = vpop.permute.xlu1 %66  ;;  %1227 = vset.pattern.permute.xlu0 %v1335_v25  ;;  %273 = vperm.xlu1 %1220, %v1478_v16   ;;  %v1520_v26 = vpop.permute.xlu0 %162 }
  0x7c   :  { %411 = vperm.xlu0 %1227, %v1392_v1  }
  0x82   :  { %v1523_v27 = vpop.permute.xlu2 %126  ;;  %289 = vperm.xlu2 %1221, %v1438_v10  }
  0x83   :  { %v1526_v28 = vpop.permute.xlu1 %71  ;;  %285 = vperm.xlu1 %1220, %v1486_v17   ;;  %v1529_v29 = vpop.permute.xlu0 %182 }
  0x84   :  { %431 = vperm.xlu0 %1227, %v1407_v5  }
  0x8a   :  { %1222 = vset.pattern.permute.xlu2 %v1334_v18 }
  0x8b   :  { %v1532_v30 = vpop.permute.xlu1 %91  ;;  %297 = vperm.xlu1 %1220, %v1494_v19   ;;  %v1535_v31 = vpop.permute.xlu2 %158  ;;  %320 = vperm.xlu2 %1222, %v1451_v12  }
  0x8c   :  { %443 = vperm.xlu0 %1227, %v1425_v8   ;;  %v1539_v32 = vpop.permute.xlu0 %194 }
  0x93   :  { %v1541_v33 = vpop.permute.xlu1 %106  ;;  %1224 = vset.pattern.permute.xlu1 %v1334_v18  ;;  %v1543_v34 = vpop.permute.xlu2 %170  ;;  %332 = vperm.xlu2 %1222, %v1412_v6  }
  0x94   :  { %455 = vperm.xlu0 %1227, %v1438_v10   ;;  %328 = vperm.xlu1 %1224, %v1392_v1   ;;  %v207_v35 = vpop.permute.xlu0 %206 }
  0x9b   :  { %v122_v36 = vpop.permute.xlu1 %121  ;;  %v1548_v37 = vpop.permute.xlu2 %178  ;;  %340 = vperm.xlu2 %1222, %v1402_v4  }
  0x9c   :  { %1228 = vset.pattern.permute.xlu0 %v1336_v38  ;;  %336 = vperm.xlu1 %1224, %v1387_v0   ;;  %v1553_v39 = vpop.permute.xlu0 %237  ;;  %v147_v63 = vsel %vm51_vm0, %v122_v36, 0.0 }
  0x9d   :  { %486 = vperm.xlu0 %1228, %v1451_v12   ;;  %v230_v2 = vsel %vm150_vm1, %v207_v35, %v147_v63 }
  0xa3   :  { %v1556_v40 = vpop.permute.xlu2 %190  ;;  %352 = vperm.xlu2 %1222, %v1420_v7  }
  0xa4   :  { %348 = vperm.xlu1 %1224, %v1407_v5   ;;  %v1560_v41 = vpop.permute.xlu1 %154  ;;  %v1562_v42 = vpop.permute.xlu0 %257 }
  0xa5   :  { %506 = vperm.xlu0 %1228, %v1402_v4  }
  0xab   :  { %v1565_v43 = vpop.permute.xlu2 %202  ;;  %364 = vperm.xlu2 %1222, %v1433_v9  }
  0xac   :  { %2498 = vst [vmem:[#allocation11_spill] sm:$0xff] %v1565_v43  ;;  %360 = vperm.xlu1 %1224, %v1425_v8   ;;  %v1569_v44 = vpop.permute.xlu1 %166  ;;  %v1571_v45 = vpop.permute.xlu0 %269 }
  0xad   :  { %518 = vperm.xlu0 %1228, %v1420_v7  }
  0xb3   :  { %v1574_v46 = vpop.permute.xlu2 %214  ;;  %376 = vperm.xlu2 %1222, %v1446_v11  }
  0xb4   :  { %2499 = vst [vmem:[#allocation12_spill] sm:$0xff] %v1574_v46  ;;  %372 = vperm.xlu1 %1224, %v1438_v10   ;;  %v175_v47 = vpop.permute.xlu1 %174  ;;  %v1578_v48 = vpop.permute.xlu0 %281 }
  0xb5   :  { %530 = vperm.xlu0 %1228, %v1433_v9  }
  0xbb   :  { %1226 = vset.pattern.permute.xlu2 %v1335_v25 }
  0xbc   :  { %1225 = vset.pattern.permute.xlu1 %v1335_v25  ;;  %v1581_v49 = vpop.permute.xlu1 %186  ;;  %v1583_v50 = vpop.permute.xlu2 %245  ;;  %407 = vperm.xlu2 %1226, %v1459_v14  }
  0xbd   :  { %542 = vperm.xlu0 %1228, %v1446_v11   ;;  %403 = vperm.xlu1 %1225, %v1451_v12   ;;  %v1588_v51 = vpop.permute.xlu0 %293 }
  0xc4   :  { %v1590_v52 = vpop.permute.xlu1 %198  ;;  %v1592_v53 = vpop.permute.xlu2 %253  ;;  %419 = vperm.xlu2 %1226, %v1387_v0  }
  0xc5   :  { %1232 = vset.pattern.permute.xlu0 %v2486_v54  ;;  %415 = vperm.xlu1 %1225, %v1412_v6   ;;  %v1597_v55 = vpop.permute.xlu0 %324  ;;  %v2488_v54 = vmov 7  }
  0xc6   :  { %573 = vperm.xlu0 %1232, %v1459_v14  }
  0xcc   :  { %v1600_v56 = vpop.permute.xlu1 %210  ;;  %v1602_v57 = vpop.permute.xlu2 %265  ;;  %427 = vperm.xlu2 %1226, %v1470_v15  }
  0xcd   :  { %423 = vperm.xlu1 %1225, %v1402_v4   ;;  %v1606_v58 = vpop.permute.xlu0 %344 }
  0xce   :  { %593 = vperm.xlu0 %1232, %v1470_v15  }
  0xd4   :  { %v1609_v59 = vpop.permute.xlu2 %277  ;;  %439 = vperm.xlu2 %1226, %v1478_v16  }
  0xd5   :  { %435 = vperm.xlu1 %1225, %v1420_v7   ;;  %v1618_v61 = vpop.permute.xlu1 %241  ;;  %v1620_v62 = vpop.permute.xlu0 %356 }
  0xd6   :  { %2500 = vst [vmem:[#allocation13_spill] sm:$0xff] %v1620_v62  ;;  %605 = vperm.xlu0 %1232, %v1478_v16  }
  0xdc   :  { %v290_v13 = vpop.permute.xlu2 %289  ;;  %451 = vperm.xlu2 %1226, %v1486_v17  }
  0xdd   :  { %v1633_v18 = vsel %vm233_vm2, %v290_v13, %v230_v2  ;;  %447 = vperm.xlu1 %1225, %v1433_v9   ;;  %v1636_v25 = vpop.permute.xlu1 %249  ;;  %v1638_v3 = vpop.permute.xlu0 %368 }
  0xde   :  { %2501 = vst [vmem:[#allocation14_spill] sm:$0xff] %v1638_v3  ;;  %617 = vperm.xlu0 %1232, %v1486_v17  }
  0xe4   :  { %463 = vperm.xlu2 %1226, %v1494_v19  }
  0xe5   :  { %459 = vperm.xlu1 %1225, %v1446_v11   ;;  %v1643_v35 = vpop.permute.xlu1 %261  ;;  %v1645_v36 = vpop.permute.xlu2 %320 }
  0xe6   :  { %629 = vperm.xlu0 %1232, %v1494_v19   ;;  %v1648_v63 = vpop.permute.xlu0 %380 }
  0xe7   :  { %2502 = vst [vmem:[#allocation15_spill] sm:$0xff] %v1648_v63  ;;  %v139_v63 = vsel %vm51_vm0, %v1504_v21, 0.0 }
  0xec   :  { %1230 = vset.pattern.permute.xlu2 %v1336_v38 }
  0xed   :  { %1229 = vset.pattern.permute.xlu1 %v1336_v38  ;;  %v1652_v2 = vpop.permute.xlu1 %273  ;;  %494 = vperm.xlu2 %1230, %v1392_v1   ;;  %v1655_v13 = vpop.permute.xlu2 %332  ;;  %v222_v38 = vsel %vm150_vm1, %v175_v47, %v139_v63  ;;  %v142_v47 = vsel %vm51_vm0, %v1509_v22, 0.0 }
  0xee   :  { %1236 = vset.pattern.permute.xlu0 %v2488_v54  ;;  %490 = vperm.xlu1 %1229, %v1459_v14   ;;  %v412_v46 = vpop.permute.xlu0 %411  ;;  %v305_v54 = vsel %vm233_vm2, %v1562_v42, %v222_v38  ;;  %v225_v63 = vsel %vm150_vm1, %v1581_v49, %v142_v47  ;;  %v145_v49 = vsel %vm51_vm0, %v1514_v23, 0.0  ;;  %v136_v38 = vsel %vm51_vm0, %v1517_v24, 0.0 }
  0xef   :  { %660 = vperm.xlu0 %1236, %v1392_v1   ;;  %v219_v47 = vsel %vm150_vm1, %v1520_v26, %v136_v38 }
  0xf0   :  { %v302_v23 = vsel %vm233_vm2, %v1583_v50, %v219_v47  ;;  %v148_v50 = vsel %vm51_vm0, %v1523_v27, 0.0 }
  0xf5   :  { %v1666_v3 = vpop.permute.xlu1 %285  ;;  %502 = vperm.xlu2 %1230, %v1387_v0   ;;  %v341_v43 = vpop.permute.xlu2 %340 }
  0xf6   :  { %2503 = vst [vmem:[#allocation16_spill] sm:$0xff] %v1666_v3  ;;  %v1674_v62 = vsel %vm316_vm3, %v341_v43, %v305_v54  ;;  %498 = vperm.xlu1 %1229, %v1412_v6   ;;  %v432_v21 = vpop.permute.xlu0 %431  ;;  %v308_v43 = vsel %vm233_vm2, %v1571_v45, %v225_v63  ;;  %v228_v45 = vsel %vm150_vm1, %v1590_v52, %v145_v49 }
  0xf7   :  { %680 = vperm.xlu0 %1236, %v1407_v5   ;;  %v231_v49 = vsel %vm150_vm1, %v1600_v56, %v148_v50  ;;  %v141_v56 = vsel %vm51_vm0, %v1532_v30, 0.0 }
  0xfd   :  { %v1684_v3 = vpop.permute.xlu1 %297  ;;  %514 = vperm.xlu2 %1230, %v1407_v5   ;;  %v353_v42 = vpop.permute.xlu2 %352 }
  0xfe   :  { %2504 = vst [vmem:[#allocation17_spill] sm:$0xff] %v1684_v3  ;;  %v1692_v54 = vsel %vm316_vm3, %v353_v42, %v308_v43  ;;  %510 = vperm.xlu1 %1229, %v1470_v15   ;;  %v444_v22 = vpop.permute.xlu0 %443  ;;  %v311_v42 = vsel %vm233_vm2, %v1578_v48, %v228_v45  ;;  %v314_v45 = vsel %vm233_vm2, %v1588_v51, %v231_v49  ;;  %v138_v49 = vsel %vm51_vm0, %v1499_v20, 0.0 }
  0xff   :  { %692 = vperm.xlu0 %1236, %v1425_v8   ;;  %v224_v51 = vsel %vm150_vm1, %v1529_v29, %v141_v56 }
 0x105   :  { %526 = vperm.xlu2 %1230, %v1425_v8   ;;  %v365_v63 = vpop.permute.xlu2 %364 }
 0x106   :  { %v1718_v24 = vsel %vm316_vm3, %v365_v63, %v311_v42  ;;  %522 = vperm.xlu1 %1229, %v1478_v16   ;;  %v329_v26 = vpop.permute.xlu1 %328  ;;  %v456_v52 = vpop.permute.xlu0 %455  ;;  %v1339_v63 = vmov 8   ;;  %v2505_v42 = vmov 6  }
 0x107   :  { %v385_v43 = vsel %vm316_vm3, %v329_v26, %v302_v23  ;;  %704 = vperm.xlu0 %1236, %v1438_v10   ;;  %v307_v23 = vsel %vm233_vm2, %v1602_v57, %v224_v51  ;;  %v144_v57 = vsel %vm51_vm0, %v1541_v33, 0.0 }
 0x108   :  { %v1726_v48 = vsel %vm399_vm4, %v412_v46, %v385_v43 }
 0x10d   :  { %538 = vperm.xlu2 %1230, %v1438_v10   ;;  %v377_v38 = vpop.permute.xlu2 %376 }
 0x10e   :  { %v1740_v47 = vsel %vm316_vm3, %v377_v38, %v314_v45  ;;  %534 = vperm.xlu1 %1229, %v1486_v17   ;;  %v337_v46 = vpop.permute.xlu1 %336  ;;  %v221_v38 = vsel %vm150_vm1, %v1543_v34, %v138_v49  ;;  %v227_v45 = vsel %vm150_vm1, %v1539_v32, %v144_v57 }
 0x10f   :  { %1237 = vset.pattern.permute.xlu0 %v1339_v63  ;;  %v1744_v27 = vpop.permute.xlu0 %486  ;;  %v310_v33 = vsel %vm233_vm2, %v1609_v59, %v227_v45 }
 0x110   :  { %735 = vperm.xlu0 %1237, %v1451_v12  }
 0x115   :  { %1231 = vset.pattern.permute.xlu2 %v2505_v42 }
 0x116   :  { %546 = vperm.xlu1 %1229, %v1494_v19   ;;  %v349_v26 = vpop.permute.xlu1 %348  ;;  %569 = vperm.xlu2 %1231, %v1451_v12   ;;  %v1759_v43 = vpop.permute.xlu2 %407 }
 0x117   :  { %v390_v30 = vsel %vm316_vm3, %v349_v26, %v307_v23  ;;  %v507_v50 = vpop.permute.xlu0 %506 }
 0x118   :  { %755 = vperm.xlu0 %1237, %v1402_v4   ;;  %v1766_v29 = vsel %vm399_vm4, %v432_v21, %v390_v30  ;;  %v304_v21 = vsel %vm233_vm2, %v1592_v53, %v221_v38 }
 0x119   :  { %v387_v56 = vsel %vm316_vm3, %v337_v46, %v304_v21 }
 0x11e   :  { %1233 = vset.pattern.permute.xlu1 %v2505_v42  ;;  %v361_v20 = vpop.permute.xlu1 %360  ;;  %581 = vperm.xlu2 %1231, %v1412_v6   ;;  %v420_v34 = vpop.permute.xlu2 %419 }
 0x11f   :  { %v393_v32 = vsel %vm316_vm3, %v361_v20, %v310_v33  ;;  %v470_v51 = vsel %vm399_vm4, %v420_v34, %v387_v56  ;;  %577 = vperm.xlu1 %1233, %v1392_v1   ;;  %v519_v53 = vpop.permute.xlu0 %518  ;;  %v2490_v56 = vmov 9  }
 0x120   :  { %767 = vperm.xlu0 %1237, %v1420_v7   ;;  %v1798_v59 = vsel %vm399_vm4, %v444_v22, %v393_v32 }
 0x126   :  { %v373_v46 = vpop.permute.xlu1 %372  ;;  %589 = vperm.xlu2 %1231, %v1402_v4   ;;  %v1801_v42 = vpop.permute.xlu2 %427 }
 0x127   :  { %v396_v23 = vsel %vm316_vm3, %v373_v46, %v1633_v18  ;;  %585 = vperm.xlu1 %1233, %v1387_v0   ;;  %v531_v26 = vpop.permute.xlu0 %530  ;;  %v137_v18 = vsel %vm51_vm0, %v1526_v28, 0.0  ;;  %v2508_v46 = vmov 7  }
 0x128   :  { %779 = vperm.xlu0 %1237, %v1433_v9   ;;  %v1810_v30 = vsel %vm399_vm4, %v456_v52, %v396_v23  ;;  %v220_v52 = vsel %vm150_vm1, %v1569_v44, %v137_v18 }
 0x129   :  { %v303_v38 = vsel %vm233_vm2, %v1636_v25, %v220_v52 }
 0x12a   :  { %v386_v21 = vsel %vm316_vm3, %v1655_v13, %v303_v38 }
 0x12e   :  { %601 = vperm.xlu2 %1231, %v1420_v7   ;;  %v1813_v22 = vpop.permute.xlu2 %439 }
 0x12f   :  { %597 = vperm.xlu1 %1233, %v1407_v5   ;;  %v1816_v57 = vpop.permute.xlu1 %403  ;;  %v543_v49 = vpop.permute.xlu0 %542 }
 0x130   :  { %791 = vperm.xlu0 %1237, %v1446_v11  }
 0x136   :  { %613 = vperm.xlu2 %1231, %v1433_v9   ;;  %v1829_v45 = vpop.permute.xlu2 %451 }
 0x137   :  { %2506 = vst [vmem:[#allocation18_spill] sm:$0xff] %v1829_v45  ;;  %609 = vperm.xlu1 %1233, %v1425_v8   ;;  %v416_v33 = vpop.permute.xlu1 %415 }
 0x138   :  { %v469_v28 = vsel %vm399_vm4, %v416_v33, %v386_v21  ;;  %1241 = vset.pattern.permute.xlu0 %v2490_v56  ;;  %v1838_v44 = vpop.permute.xlu0 %573 }
 0x139   :  { %822 = vperm.xlu0 %1241, %v1459_v14  }
 0x13e   :  { %625 = vperm.xlu2 %1231, %v1446_v11   ;;  %v1842_v25 = vpop.permute.xlu2 %463 }
 0x13f   :  { %2507 = vst [vmem:[#allocation19_spill] sm:$0xff] %v1842_v25  ;;  %621 = vperm.xlu1 %1233, %v1438_v10   ;;  %v424_v13 = vpop.permute.xlu1 %423 }
 0x140   :  { %v471_v20 = vsel %vm399_vm4, %v424_v13, %v1674_v62  ;;  %v1849_v34 = vpop.permute.xlu0 %593 }
 0x141   :  { %842 = vperm.xlu0 %1241, %v1470_v15   ;;  %v1854_v32 = vsel %vm482_vm5, %v507_v50, %v471_v20 }
 0x146   :  { %1235 = vset.pattern.permute.xlu2 %v2508_v46 }
 0x147   :  { %1234 = vset.pattern.permute.xlu1 %v2508_v46  ;;  %v436_v23 = vpop.permute.xlu1 %435  ;;  %656 = vperm.xlu2 %1235, %v1459_v14   ;;  %v495_v18 = vpop.permute.xlu2 %494 }
 0x148   :  { %v474_v62 = vsel %vm399_vm4, %v436_v23, %v1692_v54  ;;  %v1865_v52 = vsel %vm482_vm5, %v495_v18, %v1726_v48  ;;  %652 = vperm.xlu1 %1234, %v1451_v12   ;;  %v1868_v50 = vpop.permute.xlu0 %605 }
 0x149   :  { %2509 = vst [vmem:[#allocation20_spill] sm:$0xff] %v1868_v50  ;;  %854 = vperm.xlu0 %1241, %v1478_v16   ;;  %v557_v38 = vsel %vm482_vm5, %v519_v53, %v474_v62  ;;  %v2512_v62 = vmov 0  }
 0x14f   :  { %v448_v21 = vpop.permute.xlu1 %447  ;;  %668 = vperm.xlu2 %1235, %v1387_v0   ;;  %v503_v33 = vpop.permute.xlu2 %502 }
 0x150   :  { %v477_v54 = vsel %vm399_vm4, %v448_v21, %v1718_v24  ;;  %v1879_v48 = vsel %vm482_vm5, %v503_v33, %v470_v51  ;;  %664 = vperm.xlu1 %1234, %v1412_v6   ;;  %v1882_v13 = vpop.permute.xlu0 %617 }
 0x151   :  { %2510 = vst [vmem:[#allocation21_spill] sm:$0xff] %v1882_v13  ;;  %866 = vperm.xlu0 %1241, %v1486_v17   ;;  %v1887_v53 = vsel %vm482_vm5, %v531_v26, %v477_v54 }
 0x157   :  { %v460_v20 = vpop.permute.xlu1 %459  ;;  %676 = vperm.xlu2 %1235, %v1470_v15   ;;  %v515_v46 = vpop.permute.xlu2 %514 }
 0x158   :  { %v480_v24 = vsel %vm399_vm4, %v460_v20, %v1740_v47  ;;  %v1896_v51 = vsel %vm482_vm5, %v515_v46, %v1766_v29  ;;  %672 = vperm.xlu1 %1234, %v1402_v4   ;;  %v1899_v23 = vpop.permute.xlu0 %629 }
 0x159   :  { %2511 = vst [vmem:[#allocation22_spill] sm:$0xff] %v1899_v23  ;;  %878 = vperm.xlu0 %1241, %v1494_v19   ;;  %v1904_v26 = vsel %vm482_vm5, %v543_v49, %v480_v24 }
 0x15f   :  { %688 = vperm.xlu2 %1235, %v1478_v16   ;;  %v527_v18 = vpop.permute.xlu2 %526 }
 0x160   :  { %v1910_v47 = vsel %vm482_vm5, %v527_v18, %v1798_v59  ;;  %684 = vperm.xlu1 %1234, %v1420_v7   ;;  %v1913_v29 = vpop.permute.xlu1 %490 }
 0x161   :  { %1243 = vset.pattern.permute.xlu0 %v2512_v62  ;;  %v661_v21 = vpop.permute.xlu0 %660 }
 0x162   :  { %56 = vperm.xlu0 %1243, %v1451_v12  }
 0x167   :  { %700 = vperm.xlu2 %1235, %v1486_v17   ;;  %v539_v49 = vpop.permute.xlu2 %538 }
 0x168   :  { %v1921_v33 = vsel %vm482_vm5, %v539_v49, %v1810_v30  ;;  %696 = vperm.xlu1 %1234, %v1433_v9   ;;  %v499_v59 = vpop.permute.xlu1 %498 }
 0x169   :  { %v552_v54 = vsel %vm482_vm5, %v499_v59, %v469_v28  ;;  %v1926_v20 = vpop.permute.xlu0 %680 }
 0x16a   :  { %61 = vperm.xlu0 %1243, %v1459_v14  }
 0x16f   :  { %712 = vperm.xlu2 %1235, %v1494_v19  }
 0x170   :  { %708 = vperm.xlu1 %1234, %v1446_v11   ;;  %v1931_v46 = vpop.permute.xlu1 %510  ;;  %v1933_v24 = vpop.permute.xlu2 %569 }
 0x171   :  { %v1935_v30 = vpop.permute.xlu0 %692 }
 0x172   :  { %86 = vperm.xlu0 %1243, %v1470_v15  }
 0x177   :  { %1239 = vset.pattern.permute.xlu2 %v1339_v63 }
 0x178   :  { %1238 = vset.pattern.permute.xlu1 %v1339_v63  ;;  %v1941_v28 = vpop.permute.xlu1 %522  ;;  %743 = vperm.xlu2 %1239, %v1392_v1   ;;  %v582_v18 = vpop.permute.xlu2 %581 }
 0x179   :  { %v1946_v49 = vsel %vm565_vm6, %v582_v18, %v552_v54  ;;  %739 = vperm.xlu1 %1238, %v1459_v14   ;;  %v1949_v59 = vpop.permute.xlu0 %704 }
 0x17a   :  { %101 = vperm.xlu0 %1243, %v1478_v16  }
 0x180   :  { %v1952_v56 = vpop.permute.xlu1 %534  ;;  %751 = vperm.xlu2 %1239, %v1387_v0   ;;  %v590_v63 = vpop.permute.xlu2 %589 }
 0x181   :  { %2513 = vst [vmem:[#allocation23_spill] sm:$0xff] %v1952_v56  ;;  %v1958_v23 = vsel %vm565_vm6, %v590_v63, %v1854_v32  ;;  %747 = vperm.xlu1 %1238, %v1412_v6   ;;  %v1975_v32 = vld [vmem:[%s2479_s3] sm:$0xff]  ;;  %s1015_s3 = sld [smem:[#allocation4]] }
 0x182   :  { %116 = vperm.xlu0 %1243, %v1486_v17   ;;  %v1962_v54 = vpop.permute.xlu0 %735  ;;  %2516 = vst [vmem:[#allocation26_spill] sm:$0xff] %v1975_v32  ;;  %vm1005_vm7 = vcmp.gt.s32.totalorder %v1975_v32, 0 }
 0x183   :  { %2514 = vst [vmem:[#allocation24_spill] sm:$0xff] %v1962_v54 }
 0x187   :  { %p1018_p0 = scmp.gt.s32.totalorder %s1015_s3, %s1161_s10 }
 0x188   :  { %v1964_v18 = vpop.permute.xlu1 %546  ;;  %763 = vperm.xlu2 %1239, %v1407_v5   ;;  %v602_v25 = vpop.permute.xlu2 %601 }
 0x189   :  { %2515 = vst [vmem:[#allocation25_spill] sm:$0xff] %v1964_v18  ;;  %v1969_v3 = vsel %vm565_vm6, %v602_v25, %v557_v38  ;;  %759 = vperm.xlu1 %1238, %v1470_v15   ;;  %v1006_v18 = vsel %vm1005_vm7, 1, %v2512_v62  ;;  %s2538_s3 = smov (!%p1018_p0, %s1015_s3), %s1161_s10 }
 0x18a   :  { %131 = vperm.xlu0 %1243, %v1494_v19   ;;  %v1978_v63 = vpop.permute.xlu0 %755  ;;  %p1022_p1 = scmp.gt.s32.totalorder %s2538_s3, %s1162_s11 }
 0x18c   :  { %s2540_s3 = smov (!%p1022_p1, %s2538_s3), %s1162_s11 }
 0x18d   :  { %p1026_p2 = scmp.gt.s32.totalorder %s2540_s3, %s1163_s12 }
 0x18f   :  { %s2542_s3 = smov (!%p1026_p2, %s2540_s3), %s1163_s12 }
 0x190   :  { %775 = vperm.xlu2 %1239, %v1425_v8   ;;  %v614_v13 = vpop.permute.xlu2 %613  ;;  %p1030_p3 = scmp.gt.s32.totalorder %s2542_s3, %s1164_s13 }
 0x191   :  { %v1987_v25 = vsel %vm565_vm6, %v614_v13, %v1887_v53  ;;  %771 = vperm.xlu1 %1238, %v1478_v16   ;;  %v578_v38 = vpop.permute.xlu1 %577 }
 0x192   :  { %v634_v54 = vsel %vm565_vm6, %v578_v38, %v1865_v52  ;;  %v1993_v32 = vpop.permute.xlu0 %767  ;;  %1008 = vperm.xlu0 %1243, %v1006_v18   ;;  %v1341_v38 = vmov 10   ;;  %s2544_s3 = smov (!%p1030_p3, %s2542_s3), %s1164_s13 }
 0x193   :  { %v1997_v56 = vsel %vm648_vm8, %v661_v21, %v634_v54  ;;  %v2517_v21 = vmov 9   ;;  %p1034_p4 = scmp.gt.s32.totalorder %s2544_s3, %s2168_s14 }
 0x195   :  { %s2546_s3 = smov (!%p1034_p4, %s2544_s3), %s2168_s14 }
 0x196   :  { %p1038_p5 = scmp.gt.s32.totalorder %s2546_s3, %s2186_s15 }
 0x198   :  { %787 = vperm.xlu2 %1239, %v1438_v10   ;;  %v626_v45 = vpop.permute.xlu2 %625  ;;  %s2548_s3 = smov (!%p1038_p5, %s2546_s3), %s2186_s15 }
 0x199   :  { %v2003_v13 = vsel %vm565_vm6, %v626_v45, %v1904_v26  ;;  %783 = vperm.xlu1 %1238, %v1486_v17   ;;  %v586_v53 = vpop.permute.xlu1 %585  ;;  %p1042_p6 = scmp.gt.s32.totalorder %s2548_s3, %s1167_s16 }
 0x19a   :  { %v636_v52 = vsel %vm565_vm6, %v586_v53, %v1879_v48  ;;  %v2009_v18 = vpop.permute.xlu0 %779  ;;  %1246 = vset.pattern.permute.xlu0 %v1341_v38 }
 0x19b   :  { %909 = vperm.xlu0 %1246, %v1392_v1   ;;  %s2550_s3 = smov (!%p1042_p6, %s2548_s3), %s1167_s16 }
 0x19c   :  { %p1044_p7 = scmp.lt.s32.totalorder %s2550_s3, 16  ;;  %p1171_p8 = scmp.le.s32.totalorder %s2550_s3, 1 }
 0x19e   :  { %s2285_s19 = scalar_select %p1044_p7, %s2550_s3, 16 }
 0x1a0   :  { %1240 = vset.pattern.permute.xlu2 %v2517_v21 }
 0x1a1   :  { %795 = vperm.xlu1 %1238, %v1494_v19   ;;  %v598_v54 = vpop.permute.xlu1 %597  ;;  %818 = vperm.xlu2 %1240, %v1451_v12   ;;  %v2015_v45 = vpop.permute.xlu2 %656 }
 0x1a2   :  { %v639_v26 = vsel %vm565_vm6, %v598_v54, %v1896_v51  ;;  %v2020_v48 = vpop.permute.xlu0 %791 }
 0x1a3   :  { %929 = vperm.xlu0 %1246, %v1407_v5   ;;  %v2026_v53 = vsel %vm648_vm8, %v1926_v20, %v639_v26 }
 0x1a9   :  { %1242 = vset.pattern.permute.xlu1 %v2517_v21  ;;  %v610_v19 = vpop.permute.xlu1 %609  ;;  %830 = vperm.xlu2 %1240, %v1412_v6   ;;  %v669_v17 = vpop.permute.xlu2 %668 }
 0x1aa   :  { %v642_v50 = vsel %vm565_vm6, %v610_v19, %v1910_v47  ;;  %v719_v51 = vsel %vm648_vm8, %v669_v17, %v636_v52  ;;  %826 = vperm.xlu1 %1242, %v1392_v1  }
 0x1ab   :  { %v2036_v54 = vpop.permute.xlu0 %822  ;;  %957 = vperm.xlu0 %1246, %v1446_v11   ;;  %v2042_v20 = vsel %vm648_vm8, %v1935_v30, %v642_v50 }
 0x1b1   :  { %v622_v21 = vpop.permute.xlu1 %621  ;;  %838 = vperm.xlu2 %1240, %v1402_v4   ;;  %v2045_v26 = vpop.permute.xlu2 %676 }
 0x1b2   :  { %v645_v17 = vsel %vm565_vm6, %v622_v21, %v1921_v33  ;;  %834 = vperm.xlu1 %1242, %v1387_v0  }
 0x1b3   :  { %v2051_v1 = vpop.permute.xlu0 %842  ;;  %v2056_v19 = vsel %vm648_vm8, %v1949_v59, %v645_v17  ;;  %1247 = vset.pattern.permute.xlu0 %v2512_v62 }
 0x1b9   :  { %850 = vperm.xlu2 %1240, %v1420_v7   ;;  %v2060_v50 = vpop.permute.xlu2 %688 }
 0x1ba   :  { %846 = vperm.xlu1 %1242, %v1407_v5   ;;  %v653_v47 = vpop.permute.xlu1 %652 }
 0x1bb   :  { %v2063_v30 = vpop.permute.xlu0 %854 }
 0x1c1   :  { %862 = vperm.xlu2 %1240, %v1433_v9   ;;  %v2066_v33 = vpop.permute.xlu2 %700 }
 0x1c2   :  { %858 = vperm.xlu1 %1242, %v1425_v8   ;;  %v665_v52 = vpop.permute.xlu1 %664 }
 0x1c3   :  { %v2072_v62 = vsel %vm648_vm8, %v665_v52, %v1946_v49  ;;  %v2074_v59 = vpop.permute.xlu0 %866 }
 0x1c9   :  { %874 = vperm.xlu2 %1240, %v1446_v11   ;;  %v2077_v5 = vpop.permute.xlu2 %712 }
 0x1ca   :  { %870 = vperm.xlu1 %1242, %v1438_v10   ;;  %v673_v21 = vpop.permute.xlu1 %672 }
 0x1cb   :  { %v720_v8 = vsel %vm648_vm8, %v673_v21, %v1958_v23  ;;  %v2084_v17 = vpop.permute.xlu0 %878 }
 0x1cc   :  { %v2089_v49 = vsel %vm731_vm9, %v1978_v63, %v720_v8 }
 0x1d1   :  { %1245 = vset.pattern.permute.xlu2 %v1341_v38 }
 0x1d2   :  { %1244 = vset.pattern.permute.xlu1 %v1341_v38  ;;  %v685_v11 = vpop.permute.xlu1 %684  ;;  %905 = vperm.xlu2 %1245, %v1459_v14   ;;  %v744_v52 = vpop.permute.xlu2 %743 }
 0x1d3   :  { %v723_v10 = vsel %vm648_vm8, %v685_v11, %v1969_v3  ;;  %v2098_v23 = vsel %vm731_vm9, %v744_v52, %v1997_v56  ;;  %901 = vperm.xlu1 %1244, %v1451_v12  }
 0x1d4   :  { %v57_v63 = vpop.permute.xlu0 %56  ;;  %v2104_v38 = vsel %vm731_vm9, %v1993_v32, %v723_v10 }
 0x1d5   :  { %v134_v14 = vsel %vm51_vm0, %v57_v63, 0.0 }
 0x1d6   :  { %v217_v3 = vsel %vm150_vm1, %v1560_v41, %v134_v14 }
 0x1d7   :  { %v300_v56 = vsel %vm233_vm2, %v1553_v39, %v217_v3 }
 0x1d8   :  { %v383_v12 = vsel %vm316_vm3, %v1645_v36, %v300_v56  ;;  %v2518_v56 = vld [vmem:[#allocation13_spill] sm:$0xff] }
 0x1d9   :  { %v466_v32 = vsel %vm399_vm4, %v1816_v57, %v383_v12 }
 0x1da   :  { %v697_v21 = vpop.permute.xlu1 %696  ;;  %917 = vperm.xlu2 %1245, %v1387_v0   ;;  %v752_v8 = vpop.permute.xlu2 %751  ;;  %v549_v41 = vsel %vm482_vm5, %v1744_v27, %v466_v32 }
 0x1db   :  { %v726_v39 = vsel %vm648_vm8, %v697_v21, %v1987_v25  ;;  %v2129_v36 = vsel %vm731_vm9, %v752_v8, %v719_v51  ;;  %913 = vperm.xlu1 %1244, %v1412_v6   ;;  %v632_v0 = vsel %vm565_vm6, %v1933_v24, %v549_v41  ;;  %v1248_v21 = vld [vmem:[%s2477_s1 + $0x50] sm:$0xff] }
 0x1dc   :  { %v62_v57 = vpop.permute.xlu0 %61  ;;  %v2137_v27 = vsel %vm648_vm8, %v653_v47, %v632_v0  ;;  %v2142_v25 = vsel %vm731_vm9, %v2009_v18, %v726_v39  ;;  %v2520_v0 = vld [vmem:[#allocation11_spill] sm:$0xff] }
 0x1dd   :  { %v135_v51 = vsel %vm51_vm0, %v62_v57, 0.0 }
 0x1de   :  { %v218_v6 = vsel %vm150_vm1, %v1535_v31, %v135_v51  ;;  %v2521_v51 = vld [vmem:[#allocation16_spill] sm:$0xff] }
 0x1df   :  { %v301_v24 = vsel %vm233_vm2, %v1618_v61, %v218_v6  ;;  %v2522_v6 = vld [vmem:[#allocation14_spill] sm:$0xff] }
 0x1e0   :  { %v384_v47 = vsel %vm316_vm3, %v1597_v55, %v301_v24  ;;  %v2523_v24 = vld [vmem:[#allocation18_spill] sm:$0xff] }
 0x1e1   :  { %v467_v18 = vsel %vm399_vm4, %v1759_v43, %v384_v47 }
 0x1e2   :  { %v709_v11 = vpop.permute.xlu1 %708  ;;  %925 = vperm.xlu2 %1245, %v1470_v15   ;;  %v764_v52 = vpop.permute.xlu2 %763 }
 0x1e3   :  { %v729_v31 = vsel %vm648_vm8, %v709_v11, %v2003_v13  ;;  %v2165_v61 = vsel %vm731_vm9, %v764_v52, %v2026_v53  ;;  %921 = vperm.xlu1 %1244, %v1402_v4   ;;  %v550_v13 = vsel %vm482_vm5, %v1913_v29, %v467_v18  ;;  %v1249_v18 = vld [vmem:[%s2477_s1 + $0x68] sm:$0xff]  ;;  %v2524_v11 = vld [vmem:[#allocation23_spill] sm:$0xff] }
 0x1e4   :  { %v87_v55 = vpop.permute.xlu0 %86  ;;  %v2173_v15 = vsel %vm731_vm9, %v2020_v48, %v729_v31  ;;  %v633_v10 = vsel %vm565_vm6, %v1838_v44, %v550_v13  ;;  %v2525_v31 = vld [vmem:[#allocation9_spill] sm:$0xff]  ;;  %v2526_v13 = vld [vmem:[#allocation24_spill] sm:$0xff] }
 0x1e5   :  { %v140_v43 = vsel %vm51_vm0, %v87_v55, 0.0 }
 0x1e6   :  { %v223_v4 = vsel %vm150_vm1, %v1548_v37, %v140_v43 }
 0x1e7   :  { %v306_v53 = vsel %vm233_vm2, %v1643_v35, %v223_v4  ;;  %v798_v4 = vsel %vm731_vm9, %v2526_v13, %v2137_v27 }
 0x1e8   :  { %v389_v48 = vsel %vm316_vm3, %v1606_v58, %v306_v53  ;;  %v2527_v53 = vld [vmem:[#allocation21_spill] sm:$0xff] }
 0x1e9   :  { %v472_v37 = vsel %vm399_vm4, %v1801_v42, %v389_v48 }
 0x1ea   :  { %937 = vperm.xlu2 %1245, %v1478_v16   ;;  %v776_v29 = vpop.permute.xlu2 %775  ;;  %v555_v35 = vsel %vm482_vm5, %v1931_v46, %v472_v37  ;;  %v716_v16 = vsel %vm648_vm8, %v2015_v45, %v633_v10 }
 0x1eb   :  { %v2206_v58 = vsel %vm731_vm9, %v776_v29, %v2042_v20  ;;  %933 = vperm.xlu1 %1244, %v1420_v7   ;;  %v740_v42 = vpop.permute.xlu1 %739  ;;  %v638_v44 = vsel %vm565_vm6, %v1849_v34, %v555_v35  ;;  %v997_v7 = vlaneseq }
 0x1ec   :  { %v799_v46 = vsel %vm731_vm9, %v740_v42, %v716_v16  ;;  %v102_v63 = vpop.permute.xlu0 %101  ;;  %v2220_v20 = vsel %vm648_vm8, %v2045_v26, %v638_v44  ;;  %v2528_v42 = vld [vmem:[#allocation12_spill] sm:$0xff]  ;;  %v2529_v16 = vld [vmem:[#allocation17_spill] sm:$0xff] }
 0x1ed   :  { %v143_v45 = vsel %vm51_vm0, %v102_v63, 0.0  ;;  %v2228_v14 = vsel %vm814_vm10, %v2036_v54, %v799_v46  ;;  %v2233_v3 = vand.u32 127, %v997_v7  ;;  %v2530_v46 = vld [vmem:[#allocation15_spill] sm:$0xff] }
 0x1ee   :  { %v226_v34 = vsel %vm150_vm1, %v1556_v40, %v143_v45  ;;  %v2531_v7 = vld [vmem:[#allocation19_spill] sm:$0xff] }
 0x1ef   :  { %v309_v26 = vsel %vm233_vm2, %v1652_v2, %v226_v34  ;;  %vm999_vm11 = vcmp.ge.s32.totalorder %v2233_v3, 1  ;;  %vm1004_vm13 = vcmp.eq.s32.totalorder %v2233_v3, 1  ;;  %vm1003_vm15 = vcmp.eq.s32.totalorder %v2233_v3, 0 }
 0x1f0   :  { %v392_v12 = vsel %vm316_vm3, %v2518_v56, %v309_v26  ;;  %v2533_v26 = vld [vmem:[#allocation10_spill] sm:$0xff] }
 0x1f1   :  { %v475_v54 = vsel %vm399_vm4, %v1813_v22, %v392_v12  ;;  %v2519_v22 = vld [vmem:[#allocation20_spill] sm:$0xff] }
 0x1f2   :  { %945 = vperm.xlu2 %1245, %v1433_v9   ;;  %v788_v40 = vpop.permute.xlu2 %787  ;;  %v558_v32 = vsel %vm482_vm5, %v1941_v28, %v475_v54  ;;  %v2534_v54 = vld [vmem:[#allocation22_spill] sm:$0xff] }
 0x1f3   :  { %v2254_v2 = vsel %vm731_vm9, %v788_v40, %v2056_v19  ;;  %941 = vperm.xlu1 %1244, %v1248_v21   ;;  %v748_v8 = vpop.permute.xlu1 %747  ;;  %v641_v9 = vsel %vm565_vm6, %v2519_v22, %v558_v32 }
 0x1f4   :  { %v801_v28 = vsel %vm731_vm9, %v748_v8, %v2072_v62  ;;  %v117_v41 = vpop.permute.xlu0 %116  ;;  %v2268_v19 = vsel %vm648_vm8, %v2060_v50, %v641_v9 }
 0x1f5   :  { %v146_v39 = vsel %vm51_vm0, %v117_v41, 0.0 }
 0x1f6   :  { %v229_v57 = vsel %vm150_vm1, %v2520_v0, %v146_v39 }
 0x1f7   :  { %v312_v62 = vsel %vm233_vm2, %v2521_v51, %v229_v57 }
 0x1f8   :  { %v395_v50 = vsel %vm316_vm3, %v2522_v6, %v312_v62 }
 0x1f9   :  { %v478_v47 = vsel %vm399_vm4, %v2523_v24, %v395_v50 }
 0x1fa   :  { %953 = vperm.xlu2 %1245, %v1249_v18   ;;  %v561_v52 = vsel %vm482_vm5, %v2524_v11, %v478_v47 }
 0x1fb   :  { %949 = vperm.xlu1 %1244, %v2525_v31   ;;  %v760_v55 = vpop.permute.xlu1 %759  ;;  %v819_v43 = vpop.permute.xlu2 %818  ;;  %v644_v48 = vsel %vm565_vm6, %v2527_v53, %v561_v52 }
 0x1fc   :  { %v2306_v10 = vsel %vm814_vm10, %v819_v43, %v798_v4  ;;  %v132_v37 = vpop.permute.xlu0 %131  ;;  %v727_v29 = vsel %vm648_vm8, %v2066_v33, %v644_v48  ;;  %v2532_v33 = vld [vmem:[#allocation25_spill] sm:$0xff] }
 0x1fd   :  { %v149_v35 = vsel %vm51_vm0, %v132_v37, 0.0 }
 0x1fe   :  { %v232_v27 = vsel %vm150_vm1, %v2528_v42, %v149_v35 }
 0x1ff   :  { %v315_v44 = vsel %vm233_vm2, %v2529_v16, %v232_v27 }
 0x200   :  { %v398_v63 = vsel %vm316_vm3, %v2530_v46, %v315_v44 }
 0x201   :  { %v481_v45 = vsel %vm399_vm4, %v2531_v7, %v398_v63 }
 0x202   :  { %v564_v34 = vsel %vm482_vm5, %v2532_v33, %v481_v45 }
 0x203   :  { %961 = vperm.xlu1 %1244, %v2533_v26   ;;  %v772_v56 = vpop.permute.xlu1 %771  ;;  %v831_v12 = vpop.permute.xlu2 %830  ;;  %v647_v40 = vsel %vm565_vm6, %v2534_v54, %v564_v34  ;;  %v2421_v26 = vld [vmem:[%s2481_s5] sm:$0xff] }
 0x204   :  { %v2334_v32 = vsel %vm814_vm10, %v831_v12, %v801_v28  ;;  %v1009_v21 = vpop.permute.xlu0 %1008  ;;  %v730_v8 = vsel %vm648_vm8, %v2077_v5, %v647_v40  ;;  %vm1001_vm2 = vcmp.gt.s32.totalorder %v2421_v26, 0 }
 0x205   :  { %vm1010_vm14 = vcmp.eq.s32.totalorder %v1009_v21, 1 }
 0x206   :  { %vm1011_vm0 = vmand %vm1004_vm13, %vm1010_vm14 }
 0x207   :  { %vm1012_vm1 = vmor %vm1003_vm15, %vm1011_vm0 }
 0x20b   :  { %v784_v22 = vpop.permute.xlu1 %783  ;;  %v839_v9 = vpop.permute.xlu2 %838 }
 0x20c   :  { %v2341_v41 = vsel %vm731_vm9, %v784_v22, %v727_v29  ;;  %v2346_v39 = vsel %vm814_vm10, %v839_v9, %v2089_v49 }
 0x20d   :  { %v910_v0 = vpop.permute.xlu0 %909 }
 0x213   :  { %v796_v57 = vpop.permute.xlu1 %795  ;;  %v851_v28 = vpop.permute.xlu2 %850 }
 0x214   :  { %v2350_v51 = vsel %vm731_vm9, %v796_v57, %v730_v8  ;;  %v2355_v5 = vsel %vm814_vm10, %v851_v28, %v2104_v38  ;;  %v893_v8 = vsel %vm814_vm10, %v2074_v59, %v2341_v41 }
 0x215   :  { %v930_v62 = vpop.permute.xlu0 %929 }
 0x21b   :  { %v863_v6 = vpop.permute.xlu2 %862 }
 0x21c   :  { %v827_v50 = vpop.permute.xlu1 %826  ;;  %v892_v44 = vsel %vm814_vm10, %v863_v6, %v2142_v25 }
 0x21d   :  { %v883_v49 = vsel %vm814_vm10, %v827_v50, %v2098_v23  ;;  %v958_v47 = vpop.permute.xlu0 %957 }
 0x21e   :  { %v966_v24 = vsel %vm897_vm12, %v910_v0, %v883_v49 }
 0x21f   :  { %983 = vst [vmem:[#allocation2 + $0x10] sm:$0xff] %v966_v24 }
 0x223   :  { %v875_v18 = vpop.permute.xlu2 %874 }
 0x224   :  { %v895_v38 = vsel %vm814_vm10, %v875_v18, %v2173_v15  ;;  %v835_v11 = vpop.permute.xlu1 %834 }
 0x225   :  { %v978_v52 = vsel %vm897_vm12, %v958_v47, %v895_v38  ;;  %v885_v15 = vsel %vm814_vm10, %v835_v11, %v2129_v36  ;;  %v807_v36 = vsel %vm731_vm9, %v772_v56, %v2268_v19 }
 0x226   :  { %995 = vst [vmem:[#allocation2 + $0x70] sm:$0xff] %v978_v52 }
 0x22c   :  { %v847_v31 = vpop.permute.xlu1 %846  ;;  %v906_v43 = vpop.permute.xlu2 %905 }
 0x22d   :  { %v888_v23 = vsel %vm814_vm10, %v847_v31, %v2165_v61  ;;  %v965_v13 = vsel %vm897_vm12, %v906_v43, %v2228_v14  ;;  %v804_v61 = vsel %vm731_vm9, %v760_v55, %v2220_v20  ;;  %v890_v55 = vsel %vm814_vm10, %v2063_v30, %v807_v36 }
 0x22e   :  { %v971_v4 = vsel %vm897_vm12, %v930_v62, %v888_v23  ;;  %982 = vst [vmem:[#allocation2 + $0x8] sm:$0xff] %v965_v13  ;;  %v887_v35 = vsel %vm814_vm10, %v2051_v1, %v804_v61 }
 0x22f   :  { %988 = vst [vmem:[#allocation2 + $0x38] sm:$0xff] %v971_v4 }
 0x234   :  { %v859_v53 = vpop.permute.xlu1 %858  ;;  %v918_v48 = vpop.permute.xlu2 %917 }
 0x235   :  { %v968_v37 = vsel %vm897_vm12, %v918_v48, %v885_v15  ;;  %v891_v54 = vsel %vm814_vm10, %v859_v53, %v2206_v58  ;;  %v896_v58 = vsel %vm814_vm10, %v2084_v17, %v2350_v51 }
 0x236   :  { %985 = vst [vmem:[#allocation2 + $0x20] sm:$0xff] %v968_v37 }
 0x23c   :  { %v871_v14 = vpop.permute.xlu1 %870  ;;  %v926_v29 = vpop.permute.xlu2 %925 }
 0x23d   :  { %v970_v42 = vsel %vm897_vm12, %v926_v29, %v887_v35 }
 0x23e   :  { %987 = vst [vmem:[#allocation2 + $0x30] sm:$0xff] %v970_v42 }
 0x244   :  { %v938_v20 = vpop.permute.xlu2 %937 }
 0x245   :  { %v973_v1 = vsel %vm897_vm12, %v938_v20, %v890_v55  ;;  %v902_v27 = vpop.permute.xlu1 %901 }
 0x246   :  { %990 = vst [vmem:[#allocation2 + $0x48] sm:$0xff] %v973_v1  ;;  %v964_v16 = vsel %vm897_vm12, %v902_v27, %v2306_v10  ;;  %v894_v10 = vsel %vm814_vm10, %v871_v14, %v2254_v2  ;;  %v2426_v2 = vld [vmem:[%s2478_s2] sm:$0xff]  ;;  %s2450_s2 = smov (!%p1171_p8), 1  }
 0x247   :  { %981 = vst [vmem:[#allocation2] sm:$0xff] %v964_v16  ;;  %v1013_v19 = vsel %vm1012_vm1, %v964_v16, -1e+30  }
 0x248   :  { %v1326_v0 = vmov %v1013_v19  }
 0x24c   :  { %v946_v46 = vpop.permute.xlu2 %945 }
 0x24d   :  { %v975_v30 = vsel %vm897_vm12, %v946_v46, %v892_v44  ;;  %v914_v63 = vpop.permute.xlu1 %913 }
 0x24e   :  { %992 = vst [vmem:[#allocation2 + $0x58] sm:$0xff] %v975_v30  ;;  %v967_v7 = vsel %vm897_vm12, %v914_v63, %v2334_v32 }
 0x24f   :  { %984 = vst [vmem:[#allocation2 + $0x18] sm:$0xff] %v967_v7 }
 0x254   :  { %v954_v45 = vpop.permute.xlu2 %953 }
 0x255   :  { %v977_v33 = vsel %vm897_vm12, %v954_v45, %v894_v10  ;;  %v922_v25 = vpop.permute.xlu1 %921 }
 0x256   :  { %994 = vst [vmem:[#allocation2 + $0x68] sm:$0xff] %v977_v33  ;;  %v969_v34 = vsel %vm897_vm12, %v922_v25, %v2346_v39 }
 0x257   :  { %986 = vst [vmem:[#allocation2 + $0x28] sm:$0xff] %v969_v34 }
 0x25d   :  { %v934_v56 = vpop.permute.xlu1 %933 }
 0x25e   :  { %v972_v12 = vsel %vm897_vm12, %v934_v56, %v2355_v5 }
 0x25f   :  { %989 = vst [vmem:[#allocation2 + $0x40] sm:$0xff] %v972_v12 }
 0x265   :  { %v942_v40 = vpop.permute.xlu1 %941 }
 0x266   :  { %v974_v32 = vsel %vm897_vm12, %v942_v40, %v891_v54 }
 0x267   :  { %991 = vst [vmem:[#allocation2 + $0x50] sm:$0xff] %v974_v32 }
 0x26d   :  { %v950_v21 = vpop.permute.xlu1 %949 }
 0x26e   :  { %v976_v22 = vsel %vm897_vm12, %v950_v21, %v893_v8 }
 0x26f   :  { %993 = vst [vmem:[#allocation2 + $0x60] sm:$0xff] %v976_v22 }
 0x273   :  { %1156 = sbr.rel (%p1171_p8) target bundleno = 791 (0x317), region = 44 }
 0x275   :  { %v962_v9 = vpop.permute.xlu1 %961 }
 0x276   :  { %v979_v39 = vsel %vm897_vm12, %v962_v9, %v896_v58 }
 0x277   :  { %996 = vst [vmem:[#allocation2 + $0x78] sm:$0xff] %v979_v39 }
 0x278   :  { %v1318_v57 = vmov %v1013_v19  }
 0x279 LB: > { %v1342_v59 = vmov 0   ;;  %s1343_s5 = smov 1   ;;  %v1078_v60 = vstv %s1324_s2  ;;  %s1344_s25 = smov 2   ;;  %s1324_s2 = sphi %s2450_s2, %s1049_s2   ;;  %v1320_v57 = vphi %v1318_v57, %v1319_v57  }
 0x27a   : > { %1250 = vset.pattern.permute.xlu1 %v1342_v59  ;;  %1251 = vset.pattern.permute.xlu0 %v1342_v59  ;;  %vm1079_vm3 = vcmp.lt.s32.totalorder %v1078_v60, %v2426_v2  ;;  %s1169_s26 = sshll.u32 %s1324_s2, 3  ;;  %s1049_s2 = sadd.s32 1, %s1324_s2  }
 0x27b   : > { %1053 = vrot.lane.b32.xlu0 %v1320_v57, %s1343_s5  ;;  %v1080_v17 = vsel %vm1079_vm3, 1, %v1342_v59  ;;  %s1075_s27 = scalar_lea.vmem [#allocation2], %s1169_s26  ;;  %p1048_p9 = scmp.ge.s32.totalorder %s1049_s2, %s2285_s19 }
 0x27c   : > { %1082 = vperm.xlu1 %1250, %v1080_v17  }
 0x27e   : > { %v1076_v15 = vld [vmem:[%s1075_s27] sm:$0xff] }
 0x283   : > { %1056 = vrot.lane.b32.xlu0 %v1320_v57, %s1344_s25 }
 0x2ed   : > { %v1054_v41 = vpop.permute.xlu0 %1053 }
 0x2ee   : > { %v1055_v28 = vsel %vm999_vm11, %v1054_v41, -1e+30  ;;  %v1083_v4 = vpop.permute.xlu1 %1082 }
 0x2ef   : > { %v1059_v51 = vmax.f32 %v1320_v57, %v1055_v28  ;;  %v1060_v6 = vmin.f32 %v1320_v57, %v1055_v28  ;;  %vm1084_vm4 = vcmp.eq.s32.totalorder %v1083_v4, 1 }
 0x2f5   : > { %v1057_v5 = vpop.permute.xlu0 %1056 }
 0x2f6   : > { %v1058_v62 = vsel %vm1001_vm2, %v1057_v5, -1e+30 }
 0x2f7   : > { %v1061_v50 = vmax.f32 %v1059_v51, %v1058_v62  ;;  %v1062_v49 = vmin.f32 %v1059_v51, %v1058_v62 }
 0x2f9   : > { %v1063_v24 = vsub.f32 %v1060_v6, %v1061_v50  ;;  %v1067_v47 = vsub.f32 %v1062_v49, %v1061_v50 }
 0x2fb   : > { %v1064_v18 = vmul.f32 1.442695, %v1063_v24  ;;  %v1068_v38 = vmul.f32 1.442695, %v1067_v47 }
 0x2fd   : > { %1252 = vpow2.f32 %v1064_v18 }
 0x2fe   : > { %1254 = vpow2.f32 %v1068_v38 }
 0x303   : > { %v1253_v11 = vpop.eup %1252 }
 0x304   : > { %v1066_v52 = vadd.f32 1.0, %v1253_v11  ;;  %v1255_v31 = vpop.eup %1254 }
 0x306   : > { %v1070_v43 = vadd.f32 %v1255_v31, %v1066_v52 }
 0x308   : > { %1256 = vlog2.f32 %v1070_v43 }
 0x30e   : > { %v1257_v23 = vpop.eup %1256 }
 0x30f   : > { %v1072_v13 = vmul.f32 0.6931472, %v1257_v23 }
 0x311   : > { %v1073_v53 = vadd.f32 %v1072_v13, %v1061_v50 }
 0x312   :  { %1051 = sbr.rel (!%p1048_p9) target bundleno = 633 (0x279), region = 50 }
 0x313   : > { %v1077_v48 = vadd.f32 %v1076_v15, %v1073_v53 }
 0x315   : > { %v1085_v37 = vsel %vm1084_vm4, %v1077_v48, %v1320_v57  }
 0x316   : > { %v1319_v57 = vmov %v1085_v37   ;;  %v1327_v0 = vmov (%p1048_p9), %v1085_v37  }
 0x317 PF:  { %v2535_v61 = vmov 0   ;;  %v2536_v14 = vld [vmem:[#allocation26_spill] sm:$0xff]  ;;  %s1345_s28 = smov [#allocation5]   ;;  %s1142_s7 = sshll.u32 %s2482_s6, 4  ;;  %v1328_v0 = vphi %v1326_v0, %v1327_v0   ;;  %s1143_s7 = int_to_ptr.hbm [resolvable:$true] %s1142_s7 }
 0x318   :  { %1258 = vset.pattern.permute.xlu0 %v2535_v61  ;;  %v1086_v29 = vmul.u32 2, %v2536_v14  ;;  %1259 = vset.pattern.permute.xlu2 %v2535_v61  ;;  %vm1111_vm8 = vcmp.gt.s32.totalorder %v2536_v14, 1  ;;  %s1140_s0 = sshll.u32 %s1345_s28, 4  ;;  %s1141_s0 = int_to_ptr.vmem [resolvable:$true] %s1140_s0 }
 0x319   :  { %v1112_v19 = vsel %vm1111_vm8, %v2536_v14, 1 }
 0x31a   :  { %1088 = vperm.xlu0 %1258, %v1086_v29   ;;  %v1170_v35 = vadd.s32 4294967295, %v1086_v29  ;;  %v1113_v44 = vcvt.s32.f32 %v1112_v19 }
 0x31c   :  { %vm1119_vm9 = vweird.f32 %v1113_v44  ;;  %v1125_v10 = vand.u32 2147483648, %v1113_v44  ;;  %v1123_v33 = vand.u32 2147483647, %v1113_v44 }
 0x31e   :  { %v1126_v26 = vor.u32 1.1754944e-38, %v1125_v10  ;;  %vm1124_vm12 = vcmp.eq.f32.partialorder %v1123_v33, 8.507059e+37 }
 0x322   :  { %1093 = vperm.xlu0 %1258, %v1170_v35  }
 0x38c   :  { %v1089_v42 = vpop.permute.xlu0 %1088 }
 0x38d   :  { %vm1090_vm5 = vcmp.eq.s32.totalorder %v2233_v3, %v1089_v42 }
 0x394   :  { %v1094_v36 = vpop.permute.xlu0 %1093 }
 0x395   :  { %vm1095_vm6 = vcmp.eq.s32.totalorder %v2233_v3, %v1094_v36 }
 0x396   :  { %vm1096_vm7 = vmor %vm1090_vm5, %vm1095_vm6 }
 0x397   :  { %v1097_v20 = vsel %vm1096_vm7, %v1328_v0, -1e+30 }
 0x398   :  { %1098 = vmax.xlane.f32.xlu1 %v1097_v20 }
 0x40b   :  { %v1099_v55 = vpop.xlane.xlu1 %1098 }
 0x40c   :  { %v1100_v1 = vsub.f32 %v1097_v20, %v1099_v55 }
 0x40e   :  { %v1101_v27 = vmul.f32 1.442695, %v1100_v1 }
 0x410   :  { %1260 = vpow2.f32 %v1101_v27 }
 0x411   :  { %1262 = vrcp.f32 %v1113_v44 }
 0x416   :  { %v1261_v16 = vpop.eup %1260 }
 0x417   :  { %1103 = vadd.xlane.f32.xlu1 %v1261_v16  ;;  %v1263_v46 = vpop.eup %1262 }
 0x418   :  { %v1115_v30 = vmul.f32 %v1263_v46, %v1113_v44  ;;  %vm1120_vm10 = vweird.f32 %v1263_v46 }
 0x419   :  { %vm1121_vm11 = vmor %vm1119_vm9, %vm1120_vm10 }
 0x41a   :  { %v1116_v63 = vsub.f32 1.0, %v1115_v30 }
 0x41c   :  { %v1117_v3 = vmul.f32 %v1263_v46, %v1116_v63 }
 0x41e   :  { %v1118_v45 = vadd.f32 %v1263_v46, %v1117_v3 }
 0x420   :  { %v1122_v56 = vsel %vm1121_vm11, %v1263_v46, %v1118_v45 }
 0x421   :  { %v1127_v54 = vsel %vm1124_vm12, %v1126_v26, %v1122_v56 }
 0x48a   :  { %v1104_v7 = vpop.xlane.xlu1 %1103 }
 0x48b   :  { %1264 = vlog2.f32 %v1104_v7 }
 0x491   :  { %v1265_v25 = vpop.eup %1264 }
 0x492   :  { %v1106_v34 = vmul.f32 0.6931472, %v1265_v25 }
 0x494   :  { %v1107_v2 = vadd.f32 %v1106_v34, %v1099_v55 }
 0x496   :  { %v1108_v12 = vsub.f32 0.0, %v1107_v2 }
 0x498   :  { %vm1109_vm13 = vcmp.ge.f32.partialorder %v1108_v12, 5e+29 }
 0x499   :  { %v1110_v40 = vsel %vm1109_vm13, 0.0, %v1108_v12 }
 0x49a   :  { %v1128_v32 = vmul.f32 %v1127_v54, %v1110_v40 }
 0x49c   :  { %1131 = vperm.xlu2 %1259, %v1128_v32  }
 0x4f6   :  { %v1132_v21 = vpop.permute.xlu2 %1131 }
 0x4f7   :  { %1134 = vst [vmem:[#allocation5] sm:$0xff] %v1132_v21 }
 0x4f8   :  { %1145 = dma.vmem_to_hbm [thread:$0]  %s1141_s0, 128, %s1143_s7, [#allocation6]  }
 0x4f9   :  { %1316 = dma.done.wait [#allocation6], 128  }
 0x4fa   :  { %1317 = vsyncadd [#allocation6], 4294967168 }
 0x4fb   :  { %1150 = vsyncpa [#allocation6], 1 }

</bundles_post_ra>
